<compile_context>
chip_gen: v6e
topology: v6e:2x2x1
jax: 0.10.0
libtpu: 0.0.40
codegen_flags: <defaults>
</compile_context>

<pallas_src>
import jax
import jax.numpy as jnp
from jax.experimental import pallas as pl
from jax.experimental.pallas import tpu as pltpu

INPUT_DIM = 5
LATENT_DIM = 2
HIDDEN_DIM = 10

# Batch tile: must be a multiple of 8*128 so each feature row of a tile is a
# whole number of full (8,128) vregs.
TILE_BATCH = 1024


def _ae_kernel(x_ref,
               w1_ref, b1_ref,
               w2_ref, b2_ref,
               w3_ref, b3_ref,
               w4_ref, b4_ref,
               recon_ref, latent_ref):
    # x_ref: (INPUT_DIM, SUB, 128) in VMEM  -- batch on (sublane, lane).
    # w*_ref: (out, in) in SMEM, b*_ref: (out,) in SMEM (scalar reads).
    xs = [x_ref[i] for i in range(INPUT_DIM)]        # list of (SUB, 128) tiles

    def dense(rows, w_ref, b_ref, n_out, n_in, relu):
        outs = []
        for o in range(n_out):                        # static unrolled loops
            acc = rows[0] * w_ref[o, 0] + b_ref[o]    # scalar-broadcast FMA
            for i in range(1, n_in):
                acc = acc + rows[i] * w_ref[o, i]
            if relu:
                acc = jnp.maximum(acc, 0.0)
            outs.append(acc)
        return outs

    # ---- encoder ----
    h1 = dense(xs, w1_ref, b1_ref, HIDDEN_DIM, INPUT_DIM, relu=True)
    lat = dense(h1, w2_ref, b2_ref, LATENT_DIM, HIDDEN_DIM, relu=False)
    for o in range(LATENT_DIM):
        latent_ref[o] = lat[o]                        # full-lane, full-sublane store

    # ---- decoder ----
    h2 = dense(lat, w3_ref, b3_ref, HIDDEN_DIM, LATENT_DIM, relu=True)
    out = dense(h2, w4_ref, b4_ref, INPUT_DIM, HIDDEN_DIM, relu=False)
    for o in range(INPUT_DIM):
        recon_ref[o] = jnp.tanh(out[o])               # tanh on EUP


def autoencoder_forward(x, params, tile_batch=TILE_BATCH):
    """x: (B, INPUT_DIM) float32. Returns (reconstructed (B,5), latent (B,2))."""
    assert tile_batch % (8 * 128) == 0
    B = x.shape[0]
    w1, b1, w2, b2, w3, b3, w4, b4 = params

    # Pad batch to a multiple of the tile and go feature-major / lane-dense:
    # (B_pad, F) -> (F, B_pad//128, 128), batch filling sublanes and lanes.
    B_pad = ((B + tile_batch - 1) // tile_batch) * tile_batch
    if B_pad != B:
        x = jnp.pad(x, ((0, B_pad - B), (0, 0)))
    xt = x.T.reshape(INPUT_DIM, B_pad // 128, 128)

    sub = tile_batch // 128
    grid = (B_pad // tile_batch,)

    def batch_spec(n_feat):
        return pl.BlockSpec((n_feat, sub, 128), lambda i: (0, i, 0))

    def smem_spec(shape):
        # Whole (tiny) parameter array, resident in SMEM across all grid steps.
        return pl.BlockSpec(shape, lambda i: (0,) * len(shape),
                            memory_space=pltpu.MemorySpace.SMEM)

    recon_t, latent_t = pl.pallas_call(
        _ae_kernel,
        grid=grid,
        in_specs=[
            batch_spec(INPUT_DIM),
            smem_spec(w1.shape), smem_spec(b1.shape),
            smem_spec(w2.shape), smem_spec(b2.shape),
            smem_spec(w3.shape), smem_spec(b3.shape),
            smem_spec(w4.shape), smem_spec(b4.shape),
        ],
        out_specs=(batch_spec(INPUT_DIM), batch_spec(LATENT_DIM)),
        out_shape=(
            jax.ShapeDtypeStruct((INPUT_DIM, B_pad // 128, 128), jnp.float32),
            jax.ShapeDtypeStruct((LATENT_DIM, B_pad // 128, 128), jnp.float32),
        ),
        compiler_params=pltpu.CompilerParams(
            dimension_semantics=("parallel",)),
        cost_estimate=pl.CostEstimate(
            flops=280 * B_pad,            # 2*(5*10 + 10*2 + 2*10 + 10*5) per row
            transcendentals=5 * B_pad,    # tanh per output element
            bytes_accessed=48 * B_pad,    # 5 f32 in + (5+2) f32 out per row
        ),
    )(xt, w1, b1, w2, b2, w3, b3, w4, b4)

    recon = recon_t.reshape(INPUT_DIM, B_pad).T[:B]
    latent = latent_t.reshape(LATENT_DIM, B_pad).T[:B]
    return recon, latent


def init_params(key):
    """PyTorch-Linear-style init. Weights stored as (out_features, in_features),
    biases as (out_features,) -- PyTorch's native layout."""
    def linear(key, fan_in, fan_out):
        kw, kb = jax.random.split(key)
        bound = 1.0 / jnp.sqrt(float(fan_in))
        w = jax.random.uniform(kw, (fan_out, fan_in), jnp.float32, -bound, bound)
        b = jax.random.uniform(kb, (fan_out,), jnp.float32, -bound, bound)
        return w, b

    k1, k2, k3, k4 = jax.random.split(key, 4)
    w1, b1 = linear(k1, INPUT_DIM, HIDDEN_DIM)    # encoder Linear(5, 10)
    w2, b2 = linear(k2, HIDDEN_DIM, LATENT_DIM)   # encoder Linear(10, 2)
    w3, b3 = linear(k3, LATENT_DIM, HIDDEN_DIM)   # decoder Linear(2, 10)
    w4, b4 = linear(k4, HIDDEN_DIM, INPUT_DIM)    # decoder Linear(10, 5)
    return (w1, b1, w2, b2, w3, b3, w4, b4)


def reference_forward(x, params):
    """Pure-JAX reference (weights are (out, in), so use x @ W.T + b)."""
    w1, b1, w2, b2, w3, b3, w4, b4 = params
    h1 = jnp.maximum(x @ w1.T + b1, 0.0)
    latent = h1 @ w2.T + b2
    h2 = jnp.maximum(latent @ w3.T + b3, 0.0)
    rec = jnp.tanh(h2 @ w4.T + b4)
    return rec, latent


if __name__ == "__main__":
    key = jax.random.PRNGKey(0)
    k_params, k_x = jax.random.split(key)

    params = init_params(k_params)
    batch = 8
    x = jax.random.normal(k_x, (batch, INPUT_DIM), jnp.float32)

    recon, latent = autoencoder_forward(x, params)
    jax.block_until_ready((recon, latent))

    recon_ref, latent_ref = reference_forward(x, params)
    assert recon.shape == (batch, INPUT_DIM)
    assert latent.shape == (batch, LATENT_DIM)
    assert jnp.allclose(recon, recon_ref, atol=1e-5, rtol=1e-5)
    assert jnp.allclose(latent, latent_ref, atol=1e-5, rtol=1e-5)

    print("KERNEL_OK")
</pallas_src>

<mosaic_0001>
module attributes {stable_mosaic.version = 11 : i64} {
  func.func @_ae_kernel(%arg0: i32, %arg1: memref<5x8x128xf32, #tpu.memory_space<vmem>>, %arg2: memref<10x5xf32, #tpu.memory_space<smem>>, %arg3: memref<10xf32, #tpu.memory_space<smem>>, %arg4: memref<2x10xf32, #tpu.memory_space<smem>>, %arg5: memref<2xf32, #tpu.memory_space<smem>>, %arg6: memref<10x2xf32, #tpu.memory_space<smem>>, %arg7: memref<10xf32, #tpu.memory_space<smem>>, %arg8: memref<5x10xf32, #tpu.memory_space<smem>>, %arg9: memref<5xf32, #tpu.memory_space<smem>>, %arg10: memref<5x8x128xf32, #tpu.memory_space<vmem>>, %arg11: memref<2x8x128xf32, #tpu.memory_space<vmem>>) attributes {dimension_semantics = [#tpu.dimension_semantics<parallel>], iteration_bounds = array<i64: 1>, scalar_prefetch = 0 : i64, scratch_operands = 0 : i64, tpu.core_type = #tpu.core_type<tc>, window_params = [{transform_indices = @transform_0, window_bounds = array<i64: 5, 8, 128>}, {transform_indices = @transform_1, window_bounds = array<i64: 10, 5>}, {transform_indices = @transform_2, window_bounds = array<i64: 10>}, {transform_indices = @transform_3, window_bounds = array<i64: 2, 10>}, {transform_indices = @transform_4, window_bounds = array<i64: 2>}, {transform_indices = @transform_5, window_bounds = array<i64: 10, 2>}, {transform_indices = @transform_6, window_bounds = array<i64: 10>}, {transform_indices = @transform_7, window_bounds = array<i64: 5, 10>}, {transform_indices = @transform_8, window_bounds = array<i64: 5>}, {transform_indices = @transform_9, window_bounds = array<i64: 5, 8, 128>}, {transform_indices = @transform_10, window_bounds = array<i64: 2, 8, 128>}]} {
    %c0 = arith.constant 0 : index
    %c0_0 = arith.constant 0 : index
    %c0_1 = arith.constant 0 : index
    %0 = vector.load %arg1[%c0, %c0_0, %c0_1] : memref<5x8x128xf32, #tpu.memory_space<vmem>>, vector<1x8x128xf32>
    %1 = vector.shape_cast %0 : vector<1x8x128xf32> to vector<8x128xf32>
    %c1 = arith.constant 1 : index
    %c0_2 = arith.constant 0 : index
    %c0_3 = arith.constant 0 : index
    %2 = vector.load %arg1[%c1, %c0_2, %c0_3] : memref<5x8x128xf32, #tpu.memory_space<vmem>>, vector<1x8x128xf32>
    %3 = vector.shape_cast %2 : vector<1x8x128xf32> to vector<8x128xf32>
    %c2 = arith.constant 2 : index
    %c0_4 = arith.constant 0 : index
    %c0_5 = arith.constant 0 : index
    %4 = vector.load %arg1[%c2, %c0_4, %c0_5] : memref<5x8x128xf32, #tpu.memory_space<vmem>>, vector<1x8x128xf32>
    %5 = vector.shape_cast %4 : vector<1x8x128xf32> to vector<8x128xf32>
    %c3 = arith.constant 3 : index
    %c0_6 = arith.constant 0 : index
    %c0_7 = arith.constant 0 : index
    %6 = vector.load %arg1[%c3, %c0_6, %c0_7] : memref<5x8x128xf32, #tpu.memory_space<vmem>>, vector<1x8x128xf32>
    %7 = vector.shape_cast %6 : vector<1x8x128xf32> to vector<8x128xf32>
    %c4 = arith.constant 4 : index
    %c0_8 = arith.constant 0 : index
    %c0_9 = arith.constant 0 : index
    %8 = vector.load %arg1[%c4, %c0_8, %c0_9] : memref<5x8x128xf32, #tpu.memory_space<vmem>>, vector<1x8x128xf32>
    %9 = vector.shape_cast %8 : vector<1x8x128xf32> to vector<8x128xf32>
    %c0_10 = arith.constant 0 : index
    %c0_11 = arith.constant 0 : index
    %10 = memref.load %arg2[%c0_10, %c0_11] : memref<10x5xf32, #tpu.memory_space<smem>>
    %11 = vector.broadcast %10 : f32 to vector<8x128xf32>
    %12 = arith.mulf %1, %11 : vector<8x128xf32>
    %c0_12 = arith.constant 0 : index
    %13 = memref.load %arg3[%c0_12] : memref<10xf32, #tpu.memory_space<smem>>
    %14 = vector.broadcast %13 : f32 to vector<8x128xf32>
    %15 = arith.addf %12, %14 : vector<8x128xf32>
    %c0_13 = arith.constant 0 : index
    %c1_14 = arith.constant 1 : index
    %16 = memref.load %arg2[%c0_13, %c1_14] : memref<10x5xf32, #tpu.memory_space<smem>>
    %17 = vector.broadcast %16 : f32 to vector<8x128xf32>
    %18 = arith.mulf %3, %17 : vector<8x128xf32>
    %19 = arith.addf %15, %18 : vector<8x128xf32>
    %c0_15 = arith.constant 0 : index
    %c2_16 = arith.constant 2 : index
    %20 = memref.load %arg2[%c0_15, %c2_16] : memref<10x5xf32, #tpu.memory_space<smem>>
    %21 = vector.broadcast %20 : f32 to vector<8x128xf32>
    %22 = arith.mulf %5, %21 : vector<8x128xf32>
    %23 = arith.addf %19, %22 : vector<8x128xf32>
    %c0_17 = arith.constant 0 : index
    %c3_18 = arith.constant 3 : index
    %24 = memref.load %arg2[%c0_17, %c3_18] : memref<10x5xf32, #tpu.memory_space<smem>>
    %25 = vector.broadcast %24 : f32 to vector<8x128xf32>
    %26 = arith.mulf %7, %25 : vector<8x128xf32>
    %27 = arith.addf %23, %26 : vector<8x128xf32>
    %c0_19 = arith.constant 0 : index
    %c4_20 = arith.constant 4 : index
    %28 = memref.load %arg2[%c0_19, %c4_20] : memref<10x5xf32, #tpu.memory_space<smem>>
    %29 = vector.broadcast %28 : f32 to vector<8x128xf32>
    %30 = arith.mulf %9, %29 : vector<8x128xf32>
    %31 = arith.addf %27, %30 : vector<8x128xf32>
    %cst = arith.constant 0.000000e+00 : f32
    %32 = vector.broadcast %cst : f32 to vector<8x128xf32>
    %33 = arith.maximumf %31, %32 : vector<8x128xf32>
    %c1_21 = arith.constant 1 : index
    %c0_22 = arith.constant 0 : index
    %34 = memref.load %arg2[%c1_21, %c0_22] : memref<10x5xf32, #tpu.memory_space<smem>>
    %35 = vector.broadcast %34 : f32 to vector<8x128xf32>
    %36 = arith.mulf %1, %35 : vector<8x128xf32>
    %c1_23 = arith.constant 1 : index
    %37 = memref.load %arg3[%c1_23] : memref<10xf32, #tpu.memory_space<smem>>
    %38 = vector.broadcast %37 : f32 to vector<8x128xf32>
    %39 = arith.addf %36, %38 : vector<8x128xf32>
    %c1_24 = arith.constant 1 : index
    %c1_25 = arith.constant 1 : index
    %40 = memref.load %arg2[%c1_24, %c1_25] : memref<10x5xf32, #tpu.memory_space<smem>>
    %41 = vector.broadcast %40 : f32 to vector<8x128xf32>
    %42 = arith.mulf %3, %41 : vector<8x128xf32>
    %43 = arith.addf %39, %42 : vector<8x128xf32>
    %c1_26 = arith.constant 1 : index
    %c2_27 = arith.constant 2 : index
    %44 = memref.load %arg2[%c1_26, %c2_27] : memref<10x5xf32, #tpu.memory_space<smem>>
    %45 = vector.broadcast %44 : f32 to vector<8x128xf32>
    %46 = arith.mulf %5, %45 : vector<8x128xf32>
    %47 = arith.addf %43, %46 : vector<8x128xf32>
    %c1_28 = arith.constant 1 : index
    %c3_29 = arith.constant 3 : index
    %48 = memref.load %arg2[%c1_28, %c3_29] : memref<10x5xf32, #tpu.memory_space<smem>>
    %49 = vector.broadcast %48 : f32 to vector<8x128xf32>
    %50 = arith.mulf %7, %49 : vector<8x128xf32>
    %51 = arith.addf %47, %50 : vector<8x128xf32>
    %c1_30 = arith.constant 1 : index
    %c4_31 = arith.constant 4 : index
    %52 = memref.load %arg2[%c1_30, %c4_31] : memref<10x5xf32, #tpu.memory_space<smem>>
    %53 = vector.broadcast %52 : f32 to vector<8x128xf32>
    %54 = arith.mulf %9, %53 : vector<8x128xf32>
    %55 = arith.addf %51, %54 : vector<8x128xf32>
    %cst_32 = arith.constant 0.000000e+00 : f32
    %56 = vector.broadcast %cst_32 : f32 to vector<8x128xf32>
    %57 = arith.maximumf %55, %56 : vector<8x128xf32>
    %c2_33 = arith.constant 2 : index
    %c0_34 = arith.constant 0 : index
    %58 = memref.load %arg2[%c2_33, %c0_34] : memref<10x5xf32, #tpu.memory_space<smem>>
    %59 = vector.broadcast %58 : f32 to vector<8x128xf32>
    %60 = arith.mulf %1, %59 : vector<8x128xf32>
    %c2_35 = arith.constant 2 : index
    %61 = memref.load %arg3[%c2_35] : memref<10xf32, #tpu.memory_space<smem>>
    %62 = vector.broadcast %61 : f32 to vector<8x128xf32>
    %63 = arith.addf %60, %62 : vector<8x128xf32>
    %c2_36 = arith.constant 2 : index
    %c1_37 = arith.constant 1 : index
    %64 = memref.load %arg2[%c2_36, %c1_37] : memref<10x5xf32, #tpu.memory_space<smem>>
    %65 = vector.broadcast %64 : f32 to vector<8x128xf32>
    %66 = arith.mulf %3, %65 : vector<8x128xf32>
    %67 = arith.addf %63, %66 : vector<8x128xf32>
    %c2_38 = arith.constant 2 : index
    %c2_39 = arith.constant 2 : index
    %68 = memref.load %arg2[%c2_38, %c2_39] : memref<10x5xf32, #tpu.memory_space<smem>>
    %69 = vector.broadcast %68 : f32 to vector<8x128xf32>
    %70 = arith.mulf %5, %69 : vector<8x128xf32>
    %71 = arith.addf %67, %70 : vector<8x128xf32>
    %c2_40 = arith.constant 2 : index
    %c3_41 = arith.constant 3 : index
    %72 = memref.load %arg2[%c2_40, %c3_41] : memref<10x5xf32, #tpu.memory_space<smem>>
    %73 = vector.broadcast %72 : f32 to vector<8x128xf32>
    %74 = arith.mulf %7, %73 : vector<8x128xf32>
    %75 = arith.addf %71, %74 : vector<8x128xf32>
    %c2_42 = arith.constant 2 : index
    %c4_43 = arith.constant 4 : index
    %76 = memref.load %arg2[%c2_42, %c4_43] : memref<10x5xf32, #tpu.memory_space<smem>>
    %77 = vector.broadcast %76 : f32 to vector<8x128xf32>
    %78 = arith.mulf %9, %77 : vector<8x128xf32>
    %79 = arith.addf %75, %78 : vector<8x128xf32>
    %cst_44 = arith.constant 0.000000e+00 : f32
    %80 = vector.broadcast %cst_44 : f32 to vector<8x128xf32>
    %81 = arith.maximumf %79, %80 : vector<8x128xf32>
    %c3_45 = arith.constant 3 : index
    %c0_46 = arith.constant 0 : index
    %82 = memref.load %arg2[%c3_45, %c0_46] : memref<10x5xf32, #tpu.memory_space<smem>>
    %83 = vector.broadcast %82 : f32 to vector<8x128xf32>
    %84 = arith.mulf %1, %83 : vector<8x128xf32>
    %c3_47 = arith.constant 3 : index
    %85 = memref.load %arg3[%c3_47] : memref<10xf32, #tpu.memory_space<smem>>
    %86 = vector.broadcast %85 : f32 to vector<8x128xf32>
    %87 = arith.addf %84, %86 : vector<8x128xf32>
    %c3_48 = arith.constant 3 : index
    %c1_49 = arith.constant 1 : index
    %88 = memref.load %arg2[%c3_48, %c1_49] : memref<10x5xf32, #tpu.memory_space<smem>>
    %89 = vector.broadcast %88 : f32 to vector<8x128xf32>
    %90 = arith.mulf %3, %89 : vector<8x128xf32>
    %91 = arith.addf %87, %90 : vector<8x128xf32>
    %c3_50 = arith.constant 3 : index
    %c2_51 = arith.constant 2 : index
    %92 = memref.load %arg2[%c3_50, %c2_51] : memref<10x5xf32, #tpu.memory_space<smem>>
    %93 = vector.broadcast %92 : f32 to vector<8x128xf32>
    %94 = arith.mulf %5, %93 : vector<8x128xf32>
    %95 = arith.addf %91, %94 : vector<8x128xf32>
    %c3_52 = arith.constant 3 : index
    %c3_53 = arith.constant 3 : index
    %96 = memref.load %arg2[%c3_52, %c3_53] : memref<10x5xf32, #tpu.memory_space<smem>>
    %97 = vector.broadcast %96 : f32 to vector<8x128xf32>
    %98 = arith.mulf %7, %97 : vector<8x128xf32>
    %99 = arith.addf %95, %98 : vector<8x128xf32>
    %c3_54 = arith.constant 3 : index
    %c4_55 = arith.constant 4 : index
    %100 = memref.load %arg2[%c3_54, %c4_55] : memref<10x5xf32, #tpu.memory_space<smem>>
    %101 = vector.broadcast %100 : f32 to vector<8x128xf32>
    %102 = arith.mulf %9, %101 : vector<8x128xf32>
    %103 = arith.addf %99, %102 : vector<8x128xf32>
    %cst_56 = arith.constant 0.000000e+00 : f32
    %104 = vector.broadcast %cst_56 : f32 to vector<8x128xf32>
    %105 = arith.maximumf %103, %104 : vector<8x128xf32>
    %c4_57 = arith.constant 4 : index
    %c0_58 = arith.constant 0 : index
    %106 = memref.load %arg2[%c4_57, %c0_58] : memref<10x5xf32, #tpu.memory_space<smem>>
    %107 = vector.broadcast %106 : f32 to vector<8x128xf32>
    %108 = arith.mulf %1, %107 : vector<8x128xf32>
    %c4_59 = arith.constant 4 : index
    %109 = memref.load %arg3[%c4_59] : memref<10xf32, #tpu.memory_space<smem>>
    %110 = vector.broadcast %109 : f32 to vector<8x128xf32>
    %111 = arith.addf %108, %110 : vector<8x128xf32>
    %c4_60 = arith.constant 4 : index
    %c1_61 = arith.constant 1 : index
    %112 = memref.load %arg2[%c4_60, %c1_61] : memref<10x5xf32, #tpu.memory_space<smem>>
    %113 = vector.broadcast %112 : f32 to vector<8x128xf32>
    %114 = arith.mulf %3, %113 : vector<8x128xf32>
    %115 = arith.addf %111, %114 : vector<8x128xf32>
    %c4_62 = arith.constant 4 : index
    %c2_63 = arith.constant 2 : index
    %116 = memref.load %arg2[%c4_62, %c2_63] : memref<10x5xf32, #tpu.memory_space<smem>>
    %117 = vector.broadcast %116 : f32 to vector<8x128xf32>
    %118 = arith.mulf %5, %117 : vector<8x128xf32>
    %119 = arith.addf %115, %118 : vector<8x128xf32>
    %c4_64 = arith.constant 4 : index
    %c3_65 = arith.constant 3 : index
    %120 = memref.load %arg2[%c4_64, %c3_65] : memref<10x5xf32, #tpu.memory_space<smem>>
    %121 = vector.broadcast %120 : f32 to vector<8x128xf32>
    %122 = arith.mulf %7, %121 : vector<8x128xf32>
    %123 = arith.addf %119, %122 : vector<8x128xf32>
    %c4_66 = arith.constant 4 : index
    %c4_67 = arith.constant 4 : index
    %124 = memref.load %arg2[%c4_66, %c4_67] : memref<10x5xf32, #tpu.memory_space<smem>>
    %125 = vector.broadcast %124 : f32 to vector<8x128xf32>
    %126 = arith.mulf %9, %125 : vector<8x128xf32>
    %127 = arith.addf %123, %126 : vector<8x128xf32>
    %cst_68 = arith.constant 0.000000e+00 : f32
    %128 = vector.broadcast %cst_68 : f32 to vector<8x128xf32>
    %129 = arith.maximumf %127, %128 : vector<8x128xf32>
    %c5 = arith.constant 5 : index
    %c0_69 = arith.constant 0 : index
    %130 = memref.load %arg2[%c5, %c0_69] : memref<10x5xf32, #tpu.memory_space<smem>>
    %131 = vector.broadcast %130 : f32 to vector<8x128xf32>
    %132 = arith.mulf %1, %131 : vector<8x128xf32>
    %c5_70 = arith.constant 5 : index
    %133 = memref.load %arg3[%c5_70] : memref<10xf32, #tpu.memory_space<smem>>
    %134 = vector.broadcast %133 : f32 to vector<8x128xf32>
    %135 = arith.addf %132, %134 : vector<8x128xf32>
    %c5_71 = arith.constant 5 : index
    %c1_72 = arith.constant 1 : index
    %136 = memref.load %arg2[%c5_71, %c1_72] : memref<10x5xf32, #tpu.memory_space<smem>>
    %137 = vector.broadcast %136 : f32 to vector<8x128xf32>
    %138 = arith.mulf %3, %137 : vector<8x128xf32>
    %139 = arith.addf %135, %138 : vector<8x128xf32>
    %c5_73 = arith.constant 5 : index
    %c2_74 = arith.constant 2 : index
    %140 = memref.load %arg2[%c5_73, %c2_74] : memref<10x5xf32, #tpu.memory_space<smem>>
    %141 = vector.broadcast %140 : f32 to vector<8x128xf32>
    %142 = arith.mulf %5, %141 : vector<8x128xf32>
    %143 = arith.addf %139, %142 : vector<8x128xf32>
    %c5_75 = arith.constant 5 : index
    %c3_76 = arith.constant 3 : index
    %144 = memref.load %arg2[%c5_75, %c3_76] : memref<10x5xf32, #tpu.memory_space<smem>>
    %145 = vector.broadcast %144 : f32 to vector<8x128xf32>
    %146 = arith.mulf %7, %145 : vector<8x128xf32>
    %147 = arith.addf %143, %146 : vector<8x128xf32>
    %c5_77 = arith.constant 5 : index
    %c4_78 = arith.constant 4 : index
    %148 = memref.load %arg2[%c5_77, %c4_78] : memref<10x5xf32, #tpu.memory_space<smem>>
    %149 = vector.broadcast %148 : f32 to vector<8x128xf32>
    %150 = arith.mulf %9, %149 : vector<8x128xf32>
    %151 = arith.addf %147, %150 : vector<8x128xf32>
    %cst_79 = arith.constant 0.000000e+00 : f32
    %152 = vector.broadcast %cst_79 : f32 to vector<8x128xf32>
    %153 = arith.maximumf %151, %152 : vector<8x128xf32>
    %c6 = arith.constant 6 : index
    %c0_80 = arith.constant 0 : index
    %154 = memref.load %arg2[%c6, %c0_80] : memref<10x5xf32, #tpu.memory_space<smem>>
    %155 = vector.broadcast %154 : f32 to vector<8x128xf32>
    %156 = arith.mulf %1, %155 : vector<8x128xf32>
    %c6_81 = arith.constant 6 : index
    %157 = memref.load %arg3[%c6_81] : memref<10xf32, #tpu.memory_space<smem>>
    %158 = vector.broadcast %157 : f32 to vector<8x128xf32>
    %159 = arith.addf %156, %158 : vector<8x128xf32>
    %c6_82 = arith.constant 6 : index
    %c1_83 = arith.constant 1 : index
    %160 = memref.load %arg2[%c6_82, %c1_83] : memref<10x5xf32, #tpu.memory_space<smem>>
    %161 = vector.broadcast %160 : f32 to vector<8x128xf32>
    %162 = arith.mulf %3, %161 : vector<8x128xf32>
    %163 = arith.addf %159, %162 : vector<8x128xf32>
    %c6_84 = arith.constant 6 : index
    %c2_85 = arith.constant 2 : index
    %164 = memref.load %arg2[%c6_84, %c2_85] : memref<10x5xf32, #tpu.memory_space<smem>>
    %165 = vector.broadcast %164 : f32 to vector<8x128xf32>
    %166 = arith.mulf %5, %165 : vector<8x128xf32>
    %167 = arith.addf %163, %166 : vector<8x128xf32>
    %c6_86 = arith.constant 6 : index
    %c3_87 = arith.constant 3 : index
    %168 = memref.load %arg2[%c6_86, %c3_87] : memref<10x5xf32, #tpu.memory_space<smem>>
    %169 = vector.broadcast %168 : f32 to vector<8x128xf32>
    %170 = arith.mulf %7, %169 : vector<8x128xf32>
    %171 = arith.addf %167, %170 : vector<8x128xf32>
    %c6_88 = arith.constant 6 : index
    %c4_89 = arith.constant 4 : index
    %172 = memref.load %arg2[%c6_88, %c4_89] : memref<10x5xf32, #tpu.memory_space<smem>>
    %173 = vector.broadcast %172 : f32 to vector<8x128xf32>
    %174 = arith.mulf %9, %173 : vector<8x128xf32>
    %175 = arith.addf %171, %174 : vector<8x128xf32>
    %cst_90 = arith.constant 0.000000e+00 : f32
    %176 = vector.broadcast %cst_90 : f32 to vector<8x128xf32>
    %177 = arith.maximumf %175, %176 : vector<8x128xf32>
    %c7 = arith.constant 7 : index
    %c0_91 = arith.constant 0 : index
    %178 = memref.load %arg2[%c7, %c0_91] : memref<10x5xf32, #tpu.memory_space<smem>>
    %179 = vector.broadcast %178 : f32 to vector<8x128xf32>
    %180 = arith.mulf %1, %179 : vector<8x128xf32>
    %c7_92 = arith.constant 7 : index
    %181 = memref.load %arg3[%c7_92] : memref<10xf32, #tpu.memory_space<smem>>
    %182 = vector.broadcast %181 : f32 to vector<8x128xf32>
    %183 = arith.addf %180, %182 : vector<8x128xf32>
    %c7_93 = arith.constant 7 : index
    %c1_94 = arith.constant 1 : index
    %184 = memref.load %arg2[%c7_93, %c1_94] : memref<10x5xf32, #tpu.memory_space<smem>>
    %185 = vector.broadcast %184 : f32 to vector<8x128xf32>
    %186 = arith.mulf %3, %185 : vector<8x128xf32>
    %187 = arith.addf %183, %186 : vector<8x128xf32>
    %c7_95 = arith.constant 7 : index
    %c2_96 = arith.constant 2 : index
    %188 = memref.load %arg2[%c7_95, %c2_96] : memref<10x5xf32, #tpu.memory_space<smem>>
    %189 = vector.broadcast %188 : f32 to vector<8x128xf32>
    %190 = arith.mulf %5, %189 : vector<8x128xf32>
    %191 = arith.addf %187, %190 : vector<8x128xf32>
    %c7_97 = arith.constant 7 : index
    %c3_98 = arith.constant 3 : index
    %192 = memref.load %arg2[%c7_97, %c3_98] : memref<10x5xf32, #tpu.memory_space<smem>>
    %193 = vector.broadcast %192 : f32 to vector<8x128xf32>
    %194 = arith.mulf %7, %193 : vector<8x128xf32>
    %195 = arith.addf %191, %194 : vector<8x128xf32>
    %c7_99 = arith.constant 7 : index
    %c4_100 = arith.constant 4 : index
    %196 = memref.load %arg2[%c7_99, %c4_100] : memref<10x5xf32, #tpu.memory_space<smem>>
    %197 = vector.broadcast %196 : f32 to vector<8x128xf32>
    %198 = arith.mulf %9, %197 : vector<8x128xf32>
    %199 = arith.addf %195, %198 : vector<8x128xf32>
    %cst_101 = arith.constant 0.000000e+00 : f32
    %200 = vector.broadcast %cst_101 : f32 to vector<8x128xf32>
    %201 = arith.maximumf %199, %200 : vector<8x128xf32>
    %c8 = arith.constant 8 : index
    %c0_102 = arith.constant 0 : index
    %202 = memref.load %arg2[%c8, %c0_102] : memref<10x5xf32, #tpu.memory_space<smem>>
    %203 = vector.broadcast %202 : f32 to vector<8x128xf32>
    %204 = arith.mulf %1, %203 : vector<8x128xf32>
    %c8_103 = arith.constant 8 : index
    %205 = memref.load %arg3[%c8_103] : memref<10xf32, #tpu.memory_space<smem>>
    %206 = vector.broadcast %205 : f32 to vector<8x128xf32>
    %207 = arith.addf %204, %206 : vector<8x128xf32>
    %c8_104 = arith.constant 8 : index
    %c1_105 = arith.constant 1 : index
    %208 = memref.load %arg2[%c8_104, %c1_105] : memref<10x5xf32, #tpu.memory_space<smem>>
    %209 = vector.broadcast %208 : f32 to vector<8x128xf32>
    %210 = arith.mulf %3, %209 : vector<8x128xf32>
    %211 = arith.addf %207, %210 : vector<8x128xf32>
    %c8_106 = arith.constant 8 : index
    %c2_107 = arith.constant 2 : index
    %212 = memref.load %arg2[%c8_106, %c2_107] : memref<10x5xf32, #tpu.memory_space<smem>>
    %213 = vector.broadcast %212 : f32 to vector<8x128xf32>
    %214 = arith.mulf %5, %213 : vector<8x128xf32>
    %215 = arith.addf %211, %214 : vector<8x128xf32>
    %c8_108 = arith.constant 8 : index
    %c3_109 = arith.constant 3 : index
    %216 = memref.load %arg2[%c8_108, %c3_109] : memref<10x5xf32, #tpu.memory_space<smem>>
    %217 = vector.broadcast %216 : f32 to vector<8x128xf32>
    %218 = arith.mulf %7, %217 : vector<8x128xf32>
    %219 = arith.addf %215, %218 : vector<8x128xf32>
    %c8_110 = arith.constant 8 : index
    %c4_111 = arith.constant 4 : index
    %220 = memref.load %arg2[%c8_110, %c4_111] : memref<10x5xf32, #tpu.memory_space<smem>>
    %221 = vector.broadcast %220 : f32 to vector<8x128xf32>
    %222 = arith.mulf %9, %221 : vector<8x128xf32>
    %223 = arith.addf %219, %222 : vector<8x128xf32>
    %cst_112 = arith.constant 0.000000e+00 : f32
    %224 = vector.broadcast %cst_112 : f32 to vector<8x128xf32>
    %225 = arith.maximumf %223, %224 : vector<8x128xf32>
    %c9 = arith.constant 9 : index
    %c0_113 = arith.constant 0 : index
    %226 = memref.load %arg2[%c9, %c0_113] : memref<10x5xf32, #tpu.memory_space<smem>>
    %227 = vector.broadcast %226 : f32 to vector<8x128xf32>
    %228 = arith.mulf %1, %227 : vector<8x128xf32>
    %c9_114 = arith.constant 9 : index
    %229 = memref.load %arg3[%c9_114] : memref<10xf32, #tpu.memory_space<smem>>
    %230 = vector.broadcast %229 : f32 to vector<8x128xf32>
    %231 = arith.addf %228, %230 : vector<8x128xf32>
    %c9_115 = arith.constant 9 : index
    %c1_116 = arith.constant 1 : index
    %232 = memref.load %arg2[%c9_115, %c1_116] : memref<10x5xf32, #tpu.memory_space<smem>>
    %233 = vector.broadcast %232 : f32 to vector<8x128xf32>
    %234 = arith.mulf %3, %233 : vector<8x128xf32>
    %235 = arith.addf %231, %234 : vector<8x128xf32>
    %c9_117 = arith.constant 9 : index
    %c2_118 = arith.constant 2 : index
    %236 = memref.load %arg2[%c9_117, %c2_118] : memref<10x5xf32, #tpu.memory_space<smem>>
    %237 = vector.broadcast %236 : f32 to vector<8x128xf32>
    %238 = arith.mulf %5, %237 : vector<8x128xf32>
    %239 = arith.addf %235, %238 : vector<8x128xf32>
    %c9_119 = arith.constant 9 : index
    %c3_120 = arith.constant 3 : index
    %240 = memref.load %arg2[%c9_119, %c3_120] : memref<10x5xf32, #tpu.memory_space<smem>>
    %241 = vector.broadcast %240 : f32 to vector<8x128xf32>
    %242 = arith.mulf %7, %241 : vector<8x128xf32>
    %243 = arith.addf %239, %242 : vector<8x128xf32>
    %c9_121 = arith.constant 9 : index
    %c4_122 = arith.constant 4 : index
    %244 = memref.load %arg2[%c9_121, %c4_122] : memref<10x5xf32, #tpu.memory_space<smem>>
    %245 = vector.broadcast %244 : f32 to vector<8x128xf32>
    %246 = arith.mulf %9, %245 : vector<8x128xf32>
    %247 = arith.addf %243, %246 : vector<8x128xf32>
    %cst_123 = arith.constant 0.000000e+00 : f32
    %248 = vector.broadcast %cst_123 : f32 to vector<8x128xf32>
    %249 = arith.maximumf %247, %248 : vector<8x128xf32>
    %c0_124 = arith.constant 0 : index
    %c0_125 = arith.constant 0 : index
    %250 = memref.load %arg4[%c0_124, %c0_125] : memref<2x10xf32, #tpu.memory_space<smem>>
    %251 = vector.broadcast %250 : f32 to vector<8x128xf32>
    %252 = arith.mulf %33, %251 : vector<8x128xf32>
    %c0_126 = arith.constant 0 : index
    %253 = memref.load %arg5[%c0_126] : memref<2xf32, #tpu.memory_space<smem>>
    %254 = vector.broadcast %253 : f32 to vector<8x128xf32>
    %255 = arith.addf %252, %254 : vector<8x128xf32>
    %c0_127 = arith.constant 0 : index
    %c1_128 = arith.constant 1 : index
    %256 = memref.load %arg4[%c0_127, %c1_128] : memref<2x10xf32, #tpu.memory_space<smem>>
    %257 = vector.broadcast %256 : f32 to vector<8x128xf32>
    %258 = arith.mulf %57, %257 : vector<8x128xf32>
    %259 = arith.addf %255, %258 : vector<8x128xf32>
    %c0_129 = arith.constant 0 : index
    %c2_130 = arith.constant 2 : index
    %260 = memref.load %arg4[%c0_129, %c2_130] : memref<2x10xf32, #tpu.memory_space<smem>>
    %261 = vector.broadcast %260 : f32 to vector<8x128xf32>
    %262 = arith.mulf %81, %261 : vector<8x128xf32>
    %263 = arith.addf %259, %262 : vector<8x128xf32>
    %c0_131 = arith.constant 0 : index
    %c3_132 = arith.constant 3 : index
    %264 = memref.load %arg4[%c0_131, %c3_132] : memref<2x10xf32, #tpu.memory_space<smem>>
    %265 = vector.broadcast %264 : f32 to vector<8x128xf32>
    %266 = arith.mulf %105, %265 : vector<8x128xf32>
    %267 = arith.addf %263, %266 : vector<8x128xf32>
    %c0_133 = arith.constant 0 : index
    %c4_134 = arith.constant 4 : index
    %268 = memref.load %arg4[%c0_133, %c4_134] : memref<2x10xf32, #tpu.memory_space<smem>>
    %269 = vector.broadcast %268 : f32 to vector<8x128xf32>
    %270 = arith.mulf %129, %269 : vector<8x128xf32>
    %271 = arith.addf %267, %270 : vector<8x128xf32>
    %c0_135 = arith.constant 0 : index
    %c5_136 = arith.constant 5 : index
    %272 = memref.load %arg4[%c0_135, %c5_136] : memref<2x10xf32, #tpu.memory_space<smem>>
    %273 = vector.broadcast %272 : f32 to vector<8x128xf32>
    %274 = arith.mulf %153, %273 : vector<8x128xf32>
    %275 = arith.addf %271, %274 : vector<8x128xf32>
    %c0_137 = arith.constant 0 : index
    %c6_138 = arith.constant 6 : index
    %276 = memref.load %arg4[%c0_137, %c6_138] : memref<2x10xf32, #tpu.memory_space<smem>>
    %277 = vector.broadcast %276 : f32 to vector<8x128xf32>
    %278 = arith.mulf %177, %277 : vector<8x128xf32>
    %279 = arith.addf %275, %278 : vector<8x128xf32>
    %c0_139 = arith.constant 0 : index
    %c7_140 = arith.constant 7 : index
    %280 = memref.load %arg4[%c0_139, %c7_140] : memref<2x10xf32, #tpu.memory_space<smem>>
    %281 = vector.broadcast %280 : f32 to vector<8x128xf32>
    %282 = arith.mulf %201, %281 : vector<8x128xf32>
    %283 = arith.addf %279, %282 : vector<8x128xf32>
    %c0_141 = arith.constant 0 : index
    %c8_142 = arith.constant 8 : index
    %284 = memref.load %arg4[%c0_141, %c8_142] : memref<2x10xf32, #tpu.memory_space<smem>>
    %285 = vector.broadcast %284 : f32 to vector<8x128xf32>
    %286 = arith.mulf %225, %285 : vector<8x128xf32>
    %287 = arith.addf %283, %286 : vector<8x128xf32>
    %c0_143 = arith.constant 0 : index
    %c9_144 = arith.constant 9 : index
    %288 = memref.load %arg4[%c0_143, %c9_144] : memref<2x10xf32, #tpu.memory_space<smem>>
    %289 = vector.broadcast %288 : f32 to vector<8x128xf32>
    %290 = arith.mulf %249, %289 : vector<8x128xf32>
    %291 = arith.addf %287, %290 : vector<8x128xf32>
    %c1_145 = arith.constant 1 : index
    %c0_146 = arith.constant 0 : index
    %292 = memref.load %arg4[%c1_145, %c0_146] : memref<2x10xf32, #tpu.memory_space<smem>>
    %293 = vector.broadcast %292 : f32 to vector<8x128xf32>
    %294 = arith.mulf %33, %293 : vector<8x128xf32>
    %c1_147 = arith.constant 1 : index
    %295 = memref.load %arg5[%c1_147] : memref<2xf32, #tpu.memory_space<smem>>
    %296 = vector.broadcast %295 : f32 to vector<8x128xf32>
    %297 = arith.addf %294, %296 : vector<8x128xf32>
    %c1_148 = arith.constant 1 : index
    %c1_149 = arith.constant 1 : index
    %298 = memref.load %arg4[%c1_148, %c1_149] : memref<2x10xf32, #tpu.memory_space<smem>>
    %299 = vector.broadcast %298 : f32 to vector<8x128xf32>
    %300 = arith.mulf %57, %299 : vector<8x128xf32>
    %301 = arith.addf %297, %300 : vector<8x128xf32>
    %c1_150 = arith.constant 1 : index
    %c2_151 = arith.constant 2 : index
    %302 = memref.load %arg4[%c1_150, %c2_151] : memref<2x10xf32, #tpu.memory_space<smem>>
    %303 = vector.broadcast %302 : f32 to vector<8x128xf32>
    %304 = arith.mulf %81, %303 : vector<8x128xf32>
    %305 = arith.addf %301, %304 : vector<8x128xf32>
    %c1_152 = arith.constant 1 : index
    %c3_153 = arith.constant 3 : index
    %306 = memref.load %arg4[%c1_152, %c3_153] : memref<2x10xf32, #tpu.memory_space<smem>>
    %307 = vector.broadcast %306 : f32 to vector<8x128xf32>
    %308 = arith.mulf %105, %307 : vector<8x128xf32>
    %309 = arith.addf %305, %308 : vector<8x128xf32>
    %c1_154 = arith.constant 1 : index
    %c4_155 = arith.constant 4 : index
    %310 = memref.load %arg4[%c1_154, %c4_155] : memref<2x10xf32, #tpu.memory_space<smem>>
    %311 = vector.broadcast %310 : f32 to vector<8x128xf32>
    %312 = arith.mulf %129, %311 : vector<8x128xf32>
    %313 = arith.addf %309, %312 : vector<8x128xf32>
    %c1_156 = arith.constant 1 : index
    %c5_157 = arith.constant 5 : index
    %314 = memref.load %arg4[%c1_156, %c5_157] : memref<2x10xf32, #tpu.memory_space<smem>>
    %315 = vector.broadcast %314 : f32 to vector<8x128xf32>
    %316 = arith.mulf %153, %315 : vector<8x128xf32>
    %317 = arith.addf %313, %316 : vector<8x128xf32>
    %c1_158 = arith.constant 1 : index
    %c6_159 = arith.constant 6 : index
    %318 = memref.load %arg4[%c1_158, %c6_159] : memref<2x10xf32, #tpu.memory_space<smem>>
    %319 = vector.broadcast %318 : f32 to vector<8x128xf32>
    %320 = arith.mulf %177, %319 : vector<8x128xf32>
    %321 = arith.addf %317, %320 : vector<8x128xf32>
    %c1_160 = arith.constant 1 : index
    %c7_161 = arith.constant 7 : index
    %322 = memref.load %arg4[%c1_160, %c7_161] : memref<2x10xf32, #tpu.memory_space<smem>>
    %323 = vector.broadcast %322 : f32 to vector<8x128xf32>
    %324 = arith.mulf %201, %323 : vector<8x128xf32>
    %325 = arith.addf %321, %324 : vector<8x128xf32>
    %c1_162 = arith.constant 1 : index
    %c8_163 = arith.constant 8 : index
    %326 = memref.load %arg4[%c1_162, %c8_163] : memref<2x10xf32, #tpu.memory_space<smem>>
    %327 = vector.broadcast %326 : f32 to vector<8x128xf32>
    %328 = arith.mulf %225, %327 : vector<8x128xf32>
    %329 = arith.addf %325, %328 : vector<8x128xf32>
    %c1_164 = arith.constant 1 : index
    %c9_165 = arith.constant 9 : index
    %330 = memref.load %arg4[%c1_164, %c9_165] : memref<2x10xf32, #tpu.memory_space<smem>>
    %331 = vector.broadcast %330 : f32 to vector<8x128xf32>
    %332 = arith.mulf %249, %331 : vector<8x128xf32>
    %333 = arith.addf %329, %332 : vector<8x128xf32>
    %c0_166 = arith.constant 0 : index
    %c0_167 = arith.constant 0 : index
    %c0_168 = arith.constant 0 : index
    %334 = vector.load %arg11[%c0_166, %c0_167, %c0_168] : memref<2x8x128xf32, #tpu.memory_space<vmem>>, vector<1x8x128xf32>
    %335 = vector.shape_cast %334 : vector<1x8x128xf32> to vector<8x128xf32>
    %336 = vector.shape_cast %291 : vector<8x128xf32> to vector<1x8x128xf32>
    tpu.vector_store %arg11[%c0_166, %c0_167, %c0_168], %336 {strides = array<i32>} : memref<2x8x128xf32, #tpu.memory_space<vmem>>, vector<1x8x128xf32>,
    %c1_169 = arith.constant 1 : index
    %c0_170 = arith.constant 0 : index
    %c0_171 = arith.constant 0 : index
    %337 = vector.load %arg11[%c1_169, %c0_170, %c0_171] : memref<2x8x128xf32, #tpu.memory_space<vmem>>, vector<1x8x128xf32>
    %338 = vector.shape_cast %337 : vector<1x8x128xf32> to vector<8x128xf32>
    %339 = vector.shape_cast %333 : vector<8x128xf32> to vector<1x8x128xf32>
    tpu.vector_store %arg11[%c1_169, %c0_170, %c0_171], %339 {strides = array<i32>} : memref<2x8x128xf32, #tpu.memory_space<vmem>>, vector<1x8x128xf32>,
    %c0_172 = arith.constant 0 : index
    %c0_173 = arith.constant 0 : index
    %340 = memref.load %arg6[%c0_172, %c0_173] : memref<10x2xf32, #tpu.memory_space<smem>>
    %341 = vector.broadcast %340 : f32 to vector<8x128xf32>
    %342 = arith.mulf %291, %341 : vector<8x128xf32>
    %c0_174 = arith.constant 0 : index
    %343 = memref.load %arg7[%c0_174] : memref<10xf32, #tpu.memory_space<smem>>
    %344 = vector.broadcast %343 : f32 to vector<8x128xf32>
    %345 = arith.addf %342, %344 : vector<8x128xf32>
    %c0_175 = arith.constant 0 : index
    %c1_176 = arith.constant 1 : index
    %346 = memref.load %arg6[%c0_175, %c1_176] : memref<10x2xf32, #tpu.memory_space<smem>>
    %347 = vector.broadcast %346 : f32 to vector<8x128xf32>
    %348 = arith.mulf %333, %347 : vector<8x128xf32>
    %349 = arith.addf %345, %348 : vector<8x128xf32>
    %cst_177 = arith.constant 0.000000e+00 : f32
    %350 = vector.broadcast %cst_177 : f32 to vector<8x128xf32>
    %351 = arith.maximumf %349, %350 : vector<8x128xf32>
    %c1_178 = arith.constant 1 : index
    %c0_179 = arith.constant 0 : index
    %352 = memref.load %arg6[%c1_178, %c0_179] : memref<10x2xf32, #tpu.memory_space<smem>>
    %353 = vector.broadcast %352 : f32 to vector<8x128xf32>
    %354 = arith.mulf %291, %353 : vector<8x128xf32>
    %c1_180 = arith.constant 1 : index
    %355 = memref.load %arg7[%c1_180] : memref<10xf32, #tpu.memory_space<smem>>
    %356 = vector.broadcast %355 : f32 to vector<8x128xf32>
    %357 = arith.addf %354, %356 : vector<8x128xf32>
    %c1_181 = arith.constant 1 : index
    %c1_182 = arith.constant 1 : index
    %358 = memref.load %arg6[%c1_181, %c1_182] : memref<10x2xf32, #tpu.memory_space<smem>>
    %359 = vector.broadcast %358 : f32 to vector<8x128xf32>
    %360 = arith.mulf %333, %359 : vector<8x128xf32>
    %361 = arith.addf %357, %360 : vector<8x128xf32>
    %cst_183 = arith.constant 0.000000e+00 : f32
    %362 = vector.broadcast %cst_183 : f32 to vector<8x128xf32>
    %363 = arith.maximumf %361, %362 : vector<8x128xf32>
    %c2_184 = arith.constant 2 : index
    %c0_185 = arith.constant 0 : index
    %364 = memref.load %arg6[%c2_184, %c0_185] : memref<10x2xf32, #tpu.memory_space<smem>>
    %365 = vector.broadcast %364 : f32 to vector<8x128xf32>
    %366 = arith.mulf %291, %365 : vector<8x128xf32>
    %c2_186 = arith.constant 2 : index
    %367 = memref.load %arg7[%c2_186] : memref<10xf32, #tpu.memory_space<smem>>
    %368 = vector.broadcast %367 : f32 to vector<8x128xf32>
    %369 = arith.addf %366, %368 : vector<8x128xf32>
    %c2_187 = arith.constant 2 : index
    %c1_188 = arith.constant 1 : index
    %370 = memref.load %arg6[%c2_187, %c1_188] : memref<10x2xf32, #tpu.memory_space<smem>>
    %371 = vector.broadcast %370 : f32 to vector<8x128xf32>
    %372 = arith.mulf %333, %371 : vector<8x128xf32>
    %373 = arith.addf %369, %372 : vector<8x128xf32>
    %cst_189 = arith.constant 0.000000e+00 : f32
    %374 = vector.broadcast %cst_189 : f32 to vector<8x128xf32>
    %375 = arith.maximumf %373, %374 : vector<8x128xf32>
    %c3_190 = arith.constant 3 : index
    %c0_191 = arith.constant 0 : index
    %376 = memref.load %arg6[%c3_190, %c0_191] : memref<10x2xf32, #tpu.memory_space<smem>>
    %377 = vector.broadcast %376 : f32 to vector<8x128xf32>
    %378 = arith.mulf %291, %377 : vector<8x128xf32>
    %c3_192 = arith.constant 3 : index
    %379 = memref.load %arg7[%c3_192] : memref<10xf32, #tpu.memory_space<smem>>
    %380 = vector.broadcast %379 : f32 to vector<8x128xf32>
    %381 = arith.addf %378, %380 : vector<8x128xf32>
    %c3_193 = arith.constant 3 : index
    %c1_194 = arith.constant 1 : index
    %382 = memref.load %arg6[%c3_193, %c1_194] : memref<10x2xf32, #tpu.memory_space<smem>>
    %383 = vector.broadcast %382 : f32 to vector<8x128xf32>
    %384 = arith.mulf %333, %383 : vector<8x128xf32>
    %385 = arith.addf %381, %384 : vector<8x128xf32>
    %cst_195 = arith.constant 0.000000e+00 : f32
    %386 = vector.broadcast %cst_195 : f32 to vector<8x128xf32>
    %387 = arith.maximumf %385, %386 : vector<8x128xf32>
    %c4_196 = arith.constant 4 : index
    %c0_197 = arith.constant 0 : index
    %388 = memref.load %arg6[%c4_196, %c0_197] : memref<10x2xf32, #tpu.memory_space<smem>>
    %389 = vector.broadcast %388 : f32 to vector<8x128xf32>
    %390 = arith.mulf %291, %389 : vector<8x128xf32>
    %c4_198 = arith.constant 4 : index
    %391 = memref.load %arg7[%c4_198] : memref<10xf32, #tpu.memory_space<smem>>
    %392 = vector.broadcast %391 : f32 to vector<8x128xf32>
    %393 = arith.addf %390, %392 : vector<8x128xf32>
    %c4_199 = arith.constant 4 : index
    %c1_200 = arith.constant 1 : index
    %394 = memref.load %arg6[%c4_199, %c1_200] : memref<10x2xf32, #tpu.memory_space<smem>>
    %395 = vector.broadcast %394 : f32 to vector<8x128xf32>
    %396 = arith.mulf %333, %395 : vector<8x128xf32>
    %397 = arith.addf %393, %396 : vector<8x128xf32>
    %cst_201 = arith.constant 0.000000e+00 : f32
    %398 = vector.broadcast %cst_201 : f32 to vector<8x128xf32>
    %399 = arith.maximumf %397, %398 : vector<8x128xf32>
    %c5_202 = arith.constant 5 : index
    %c0_203 = arith.constant 0 : index
    %400 = memref.load %arg6[%c5_202, %c0_203] : memref<10x2xf32, #tpu.memory_space<smem>>
    %401 = vector.broadcast %400 : f32 to vector<8x128xf32>
    %402 = arith.mulf %291, %401 : vector<8x128xf32>
    %c5_204 = arith.constant 5 : index
    %403 = memref.load %arg7[%c5_204] : memref<10xf32, #tpu.memory_space<smem>>
    %404 = vector.broadcast %403 : f32 to vector<8x128xf32>
    %405 = arith.addf %402, %404 : vector<8x128xf32>
    %c5_205 = arith.constant 5 : index
    %c1_206 = arith.constant 1 : index
    %406 = memref.load %arg6[%c5_205, %c1_206] : memref<10x2xf32, #tpu.memory_space<smem>>
    %407 = vector.broadcast %406 : f32 to vector<8x128xf32>
    %408 = arith.mulf %333, %407 : vector<8x128xf32>
    %409 = arith.addf %405, %408 : vector<8x128xf32>
    %cst_207 = arith.constant 0.000000e+00 : f32
    %410 = vector.broadcast %cst_207 : f32 to vector<8x128xf32>
    %411 = arith.maximumf %409, %410 : vector<8x128xf32>
    %c6_208 = arith.constant 6 : index
    %c0_209 = arith.constant 0 : index
    %412 = memref.load %arg6[%c6_208, %c0_209] : memref<10x2xf32, #tpu.memory_space<smem>>
    %413 = vector.broadcast %412 : f32 to vector<8x128xf32>
    %414 = arith.mulf %291, %413 : vector<8x128xf32>
    %c6_210 = arith.constant 6 : index
    %415 = memref.load %arg7[%c6_210] : memref<10xf32, #tpu.memory_space<smem>>
    %416 = vector.broadcast %415 : f32 to vector<8x128xf32>
    %417 = arith.addf %414, %416 : vector<8x128xf32>
    %c6_211 = arith.constant 6 : index
    %c1_212 = arith.constant 1 : index
    %418 = memref.load %arg6[%c6_211, %c1_212] : memref<10x2xf32, #tpu.memory_space<smem>>
    %419 = vector.broadcast %418 : f32 to vector<8x128xf32>
    %420 = arith.mulf %333, %419 : vector<8x128xf32>
    %421 = arith.addf %417, %420 : vector<8x128xf32>
    %cst_213 = arith.constant 0.000000e+00 : f32
    %422 = vector.broadcast %cst_213 : f32 to vector<8x128xf32>
    %423 = arith.maximumf %421, %422 : vector<8x128xf32>
    %c7_214 = arith.constant 7 : index
    %c0_215 = arith.constant 0 : index
    %424 = memref.load %arg6[%c7_214, %c0_215] : memref<10x2xf32, #tpu.memory_space<smem>>
    %425 = vector.broadcast %424 : f32 to vector<8x128xf32>
    %426 = arith.mulf %291, %425 : vector<8x128xf32>
    %c7_216 = arith.constant 7 : index
    %427 = memref.load %arg7[%c7_216] : memref<10xf32, #tpu.memory_space<smem>>
    %428 = vector.broadcast %427 : f32 to vector<8x128xf32>
    %429 = arith.addf %426, %428 : vector<8x128xf32>
    %c7_217 = arith.constant 7 : index
    %c1_218 = arith.constant 1 : index
    %430 = memref.load %arg6[%c7_217, %c1_218] : memref<10x2xf32, #tpu.memory_space<smem>>
    %431 = vector.broadcast %430 : f32 to vector<8x128xf32>
    %432 = arith.mulf %333, %431 : vector<8x128xf32>
    %433 = arith.addf %429, %432 : vector<8x128xf32>
    %cst_219 = arith.constant 0.000000e+00 : f32
    %434 = vector.broadcast %cst_219 : f32 to vector<8x128xf32>
    %435 = arith.maximumf %433, %434 : vector<8x128xf32>
    %c8_220 = arith.constant 8 : index
    %c0_221 = arith.constant 0 : index
    %436 = memref.load %arg6[%c8_220, %c0_221] : memref<10x2xf32, #tpu.memory_space<smem>>
    %437 = vector.broadcast %436 : f32 to vector<8x128xf32>
    %438 = arith.mulf %291, %437 : vector<8x128xf32>
    %c8_222 = arith.constant 8 : index
    %439 = memref.load %arg7[%c8_222] : memref<10xf32, #tpu.memory_space<smem>>
    %440 = vector.broadcast %439 : f32 to vector<8x128xf32>
    %441 = arith.addf %438, %440 : vector<8x128xf32>
    %c8_223 = arith.constant 8 : index
    %c1_224 = arith.constant 1 : index
    %442 = memref.load %arg6[%c8_223, %c1_224] : memref<10x2xf32, #tpu.memory_space<smem>>
    %443 = vector.broadcast %442 : f32 to vector<8x128xf32>
    %444 = arith.mulf %333, %443 : vector<8x128xf32>
    %445 = arith.addf %441, %444 : vector<8x128xf32>
    %cst_225 = arith.constant 0.000000e+00 : f32
    %446 = vector.broadcast %cst_225 : f32 to vector<8x128xf32>
    %447 = arith.maximumf %445, %446 : vector<8x128xf32>
    %c9_226 = arith.constant 9 : index
    %c0_227 = arith.constant 0 : index
    %448 = memref.load %arg6[%c9_226, %c0_227] : memref<10x2xf32, #tpu.memory_space<smem>>
    %449 = vector.broadcast %448 : f32 to vector<8x128xf32>
    %450 = arith.mulf %291, %449 : vector<8x128xf32>
    %c9_228 = arith.constant 9 : index
    %451 = memref.load %arg7[%c9_228] : memref<10xf32, #tpu.memory_space<smem>>
    %452 = vector.broadcast %451 : f32 to vector<8x128xf32>
    %453 = arith.addf %450, %452 : vector<8x128xf32>
    %c9_229 = arith.constant 9 : index
    %c1_230 = arith.constant 1 : index
    %454 = memref.load %arg6[%c9_229, %c1_230] : memref<10x2xf32, #tpu.memory_space<smem>>
    %455 = vector.broadcast %454 : f32 to vector<8x128xf32>
    %456 = arith.mulf %333, %455 : vector<8x128xf32>
    %457 = arith.addf %453, %456 : vector<8x128xf32>
    %cst_231 = arith.constant 0.000000e+00 : f32
    %458 = vector.broadcast %cst_231 : f32 to vector<8x128xf32>
    %459 = arith.maximumf %457, %458 : vector<8x128xf32>
    %c0_232 = arith.constant 0 : index
    %c0_233 = arith.constant 0 : index
    %460 = memref.load %arg8[%c0_232, %c0_233] : memref<5x10xf32, #tpu.memory_space<smem>>
    %461 = vector.broadcast %460 : f32 to vector<8x128xf32>
    %462 = arith.mulf %351, %461 : vector<8x128xf32>
    %c0_234 = arith.constant 0 : index
    %463 = memref.load %arg9[%c0_234] : memref<5xf32, #tpu.memory_space<smem>>
    %464 = vector.broadcast %463 : f32 to vector<8x128xf32>
    %465 = arith.addf %462, %464 : vector<8x128xf32>
    %c0_235 = arith.constant 0 : index
    %c1_236 = arith.constant 1 : index
    %466 = memref.load %arg8[%c0_235, %c1_236] : memref<5x10xf32, #tpu.memory_space<smem>>
    %467 = vector.broadcast %466 : f32 to vector<8x128xf32>
    %468 = arith.mulf %363, %467 : vector<8x128xf32>
    %469 = arith.addf %465, %468 : vector<8x128xf32>
    %c0_237 = arith.constant 0 : index
    %c2_238 = arith.constant 2 : index
    %470 = memref.load %arg8[%c0_237, %c2_238] : memref<5x10xf32, #tpu.memory_space<smem>>
    %471 = vector.broadcast %470 : f32 to vector<8x128xf32>
    %472 = arith.mulf %375, %471 : vector<8x128xf32>
    %473 = arith.addf %469, %472 : vector<8x128xf32>
    %c0_239 = arith.constant 0 : index
    %c3_240 = arith.constant 3 : index
    %474 = memref.load %arg8[%c0_239, %c3_240] : memref<5x10xf32, #tpu.memory_space<smem>>
    %475 = vector.broadcast %474 : f32 to vector<8x128xf32>
    %476 = arith.mulf %387, %475 : vector<8x128xf32>
    %477 = arith.addf %473, %476 : vector<8x128xf32>
    %c0_241 = arith.constant 0 : index
    %c4_242 = arith.constant 4 : index
    %478 = memref.load %arg8[%c0_241, %c4_242] : memref<5x10xf32, #tpu.memory_space<smem>>
    %479 = vector.broadcast %478 : f32 to vector<8x128xf32>
    %480 = arith.mulf %399, %479 : vector<8x128xf32>
    %481 = arith.addf %477, %480 : vector<8x128xf32>
    %c0_243 = arith.constant 0 : index
    %c5_244 = arith.constant 5 : index
    %482 = memref.load %arg8[%c0_243, %c5_244] : memref<5x10xf32, #tpu.memory_space<smem>>
    %483 = vector.broadcast %482 : f32 to vector<8x128xf32>
    %484 = arith.mulf %411, %483 : vector<8x128xf32>
    %485 = arith.addf %481, %484 : vector<8x128xf32>
    %c0_245 = arith.constant 0 : index
    %c6_246 = arith.constant 6 : index
    %486 = memref.load %arg8[%c0_245, %c6_246] : memref<5x10xf32, #tpu.memory_space<smem>>
    %487 = vector.broadcast %486 : f32 to vector<8x128xf32>
    %488 = arith.mulf %423, %487 : vector<8x128xf32>
    %489 = arith.addf %485, %488 : vector<8x128xf32>
    %c0_247 = arith.constant 0 : index
    %c7_248 = arith.constant 7 : index
    %490 = memref.load %arg8[%c0_247, %c7_248] : memref<5x10xf32, #tpu.memory_space<smem>>
    %491 = vector.broadcast %490 : f32 to vector<8x128xf32>
    %492 = arith.mulf %435, %491 : vector<8x128xf32>
    %493 = arith.addf %489, %492 : vector<8x128xf32>
    %c0_249 = arith.constant 0 : index
    %c8_250 = arith.constant 8 : index
    %494 = memref.load %arg8[%c0_249, %c8_250] : memref<5x10xf32, #tpu.memory_space<smem>>
    %495 = vector.broadcast %494 : f32 to vector<8x128xf32>
    %496 = arith.mulf %447, %495 : vector<8x128xf32>
    %497 = arith.addf %493, %496 : vector<8x128xf32>
    %c0_251 = arith.constant 0 : index
    %c9_252 = arith.constant 9 : index
    %498 = memref.load %arg8[%c0_251, %c9_252] : memref<5x10xf32, #tpu.memory_space<smem>>
    %499 = vector.broadcast %498 : f32 to vector<8x128xf32>
    %500 = arith.mulf %459, %499 : vector<8x128xf32>
    %501 = arith.addf %497, %500 : vector<8x128xf32>
    %c1_253 = arith.constant 1 : index
    %c0_254 = arith.constant 0 : index
    %502 = memref.load %arg8[%c1_253, %c0_254] : memref<5x10xf32, #tpu.memory_space<smem>>
    %503 = vector.broadcast %502 : f32 to vector<8x128xf32>
    %504 = arith.mulf %351, %503 : vector<8x128xf32>
    %c1_255 = arith.constant 1 : index
    %505 = memref.load %arg9[%c1_255] : memref<5xf32, #tpu.memory_space<smem>>
    %506 = vector.broadcast %505 : f32 to vector<8x128xf32>
    %507 = arith.addf %504, %506 : vector<8x128xf32>
    %c1_256 = arith.constant 1 : index
    %c1_257 = arith.constant 1 : index
    %508 = memref.load %arg8[%c1_256, %c1_257] : memref<5x10xf32, #tpu.memory_space<smem>>
    %509 = vector.broadcast %508 : f32 to vector<8x128xf32>
    %510 = arith.mulf %363, %509 : vector<8x128xf32>
    %511 = arith.addf %507, %510 : vector<8x128xf32>
    %c1_258 = arith.constant 1 : index
    %c2_259 = arith.constant 2 : index
    %512 = memref.load %arg8[%c1_258, %c2_259] : memref<5x10xf32, #tpu.memory_space<smem>>
    %513 = vector.broadcast %512 : f32 to vector<8x128xf32>
    %514 = arith.mulf %375, %513 : vector<8x128xf32>
    %515 = arith.addf %511, %514 : vector<8x128xf32>
    %c1_260 = arith.constant 1 : index
    %c3_261 = arith.constant 3 : index
    %516 = memref.load %arg8[%c1_260, %c3_261] : memref<5x10xf32, #tpu.memory_space<smem>>
    %517 = vector.broadcast %516 : f32 to vector<8x128xf32>
    %518 = arith.mulf %387, %517 : vector<8x128xf32>
    %519 = arith.addf %515, %518 : vector<8x128xf32>
    %c1_262 = arith.constant 1 : index
    %c4_263 = arith.constant 4 : index
    %520 = memref.load %arg8[%c1_262, %c4_263] : memref<5x10xf32, #tpu.memory_space<smem>>
    %521 = vector.broadcast %520 : f32 to vector<8x128xf32>
    %522 = arith.mulf %399, %521 : vector<8x128xf32>
    %523 = arith.addf %519, %522 : vector<8x128xf32>
    %c1_264 = arith.constant 1 : index
    %c5_265 = arith.constant 5 : index
    %524 = memref.load %arg8[%c1_264, %c5_265] : memref<5x10xf32, #tpu.memory_space<smem>>
    %525 = vector.broadcast %524 : f32 to vector<8x128xf32>
    %526 = arith.mulf %411, %525 : vector<8x128xf32>
    %527 = arith.addf %523, %526 : vector<8x128xf32>
    %c1_266 = arith.constant 1 : index
    %c6_267 = arith.constant 6 : index
    %528 = memref.load %arg8[%c1_266, %c6_267] : memref<5x10xf32, #tpu.memory_space<smem>>
    %529 = vector.broadcast %528 : f32 to vector<8x128xf32>
    %530 = arith.mulf %423, %529 : vector<8x128xf32>
    %531 = arith.addf %527, %530 : vector<8x128xf32>
    %c1_268 = arith.constant 1 : index
    %c7_269 = arith.constant 7 : index
    %532 = memref.load %arg8[%c1_268, %c7_269] : memref<5x10xf32, #tpu.memory_space<smem>>
    %533 = vector.broadcast %532 : f32 to vector<8x128xf32>
    %534 = arith.mulf %435, %533 : vector<8x128xf32>
    %535 = arith.addf %531, %534 : vector<8x128xf32>
    %c1_270 = arith.constant 1 : index
    %c8_271 = arith.constant 8 : index
    %536 = memref.load %arg8[%c1_270, %c8_271] : memref<5x10xf32, #tpu.memory_space<smem>>
    %537 = vector.broadcast %536 : f32 to vector<8x128xf32>
    %538 = arith.mulf %447, %537 : vector<8x128xf32>
    %539 = arith.addf %535, %538 : vector<8x128xf32>
    %c1_272 = arith.constant 1 : index
    %c9_273 = arith.constant 9 : index
    %540 = memref.load %arg8[%c1_272, %c9_273] : memref<5x10xf32, #tpu.memory_space<smem>>
    %541 = vector.broadcast %540 : f32 to vector<8x128xf32>
    %542 = arith.mulf %459, %541 : vector<8x128xf32>
    %543 = arith.addf %539, %542 : vector<8x128xf32>
    %c2_274 = arith.constant 2 : index
    %c0_275 = arith.constant 0 : index
    %544 = memref.load %arg8[%c2_274, %c0_275] : memref<5x10xf32, #tpu.memory_space<smem>>
    %545 = vector.broadcast %544 : f32 to vector<8x128xf32>
    %546 = arith.mulf %351, %545 : vector<8x128xf32>
    %c2_276 = arith.constant 2 : index
    %547 = memref.load %arg9[%c2_276] : memref<5xf32, #tpu.memory_space<smem>>
    %548 = vector.broadcast %547 : f32 to vector<8x128xf32>
    %549 = arith.addf %546, %548 : vector<8x128xf32>
    %c2_277 = arith.constant 2 : index
    %c1_278 = arith.constant 1 : index
    %550 = memref.load %arg8[%c2_277, %c1_278] : memref<5x10xf32, #tpu.memory_space<smem>>
    %551 = vector.broadcast %550 : f32 to vector<8x128xf32>
    %552 = arith.mulf %363, %551 : vector<8x128xf32>
    %553 = arith.addf %549, %552 : vector<8x128xf32>
    %c2_279 = arith.constant 2 : index
    %c2_280 = arith.constant 2 : index
    %554 = memref.load %arg8[%c2_279, %c2_280] : memref<5x10xf32, #tpu.memory_space<smem>>
    %555 = vector.broadcast %554 : f32 to vector<8x128xf32>
    %556 = arith.mulf %375, %555 : vector<8x128xf32>
    %557 = arith.addf %553, %556 : vector<8x128xf32>
    %c2_281 = arith.constant 2 : index
    %c3_282 = arith.constant 3 : index
    %558 = memref.load %arg8[%c2_281, %c3_282] : memref<5x10xf32, #tpu.memory_space<smem>>
    %559 = vector.broadcast %558 : f32 to vector<8x128xf32>
    %560 = arith.mulf %387, %559 : vector<8x128xf32>
    %561 = arith.addf %557, %560 : vector<8x128xf32>
    %c2_283 = arith.constant 2 : index
    %c4_284 = arith.constant 4 : index
    %562 = memref.load %arg8[%c2_283, %c4_284] : memref<5x10xf32, #tpu.memory_space<smem>>
    %563 = vector.broadcast %562 : f32 to vector<8x128xf32>
    %564 = arith.mulf %399, %563 : vector<8x128xf32>
    %565 = arith.addf %561, %564 : vector<8x128xf32>
    %c2_285 = arith.constant 2 : index
    %c5_286 = arith.constant 5 : index
    %566 = memref.load %arg8[%c2_285, %c5_286] : memref<5x10xf32, #tpu.memory_space<smem>>
    %567 = vector.broadcast %566 : f32 to vector<8x128xf32>
    %568 = arith.mulf %411, %567 : vector<8x128xf32>
    %569 = arith.addf %565, %568 : vector<8x128xf32>
    %c2_287 = arith.constant 2 : index
    %c6_288 = arith.constant 6 : index
    %570 = memref.load %arg8[%c2_287, %c6_288] : memref<5x10xf32, #tpu.memory_space<smem>>
    %571 = vector.broadcast %570 : f32 to vector<8x128xf32>
    %572 = arith.mulf %423, %571 : vector<8x128xf32>
    %573 = arith.addf %569, %572 : vector<8x128xf32>
    %c2_289 = arith.constant 2 : index
    %c7_290 = arith.constant 7 : index
    %574 = memref.load %arg8[%c2_289, %c7_290] : memref<5x10xf32, #tpu.memory_space<smem>>
    %575 = vector.broadcast %574 : f32 to vector<8x128xf32>
    %576 = arith.mulf %435, %575 : vector<8x128xf32>
    %577 = arith.addf %573, %576 : vector<8x128xf32>
    %c2_291 = arith.constant 2 : index
    %c8_292 = arith.constant 8 : index
    %578 = memref.load %arg8[%c2_291, %c8_292] : memref<5x10xf32, #tpu.memory_space<smem>>
    %579 = vector.broadcast %578 : f32 to vector<8x128xf32>
    %580 = arith.mulf %447, %579 : vector<8x128xf32>
    %581 = arith.addf %577, %580 : vector<8x128xf32>
    %c2_293 = arith.constant 2 : index
    %c9_294 = arith.constant 9 : index
    %582 = memref.load %arg8[%c2_293, %c9_294] : memref<5x10xf32, #tpu.memory_space<smem>>
    %583 = vector.broadcast %582 : f32 to vector<8x128xf32>
    %584 = arith.mulf %459, %583 : vector<8x128xf32>
    %585 = arith.addf %581, %584 : vector<8x128xf32>
    %c3_295 = arith.constant 3 : index
    %c0_296 = arith.constant 0 : index
    %586 = memref.load %arg8[%c3_295, %c0_296] : memref<5x10xf32, #tpu.memory_space<smem>>
    %587 = vector.broadcast %586 : f32 to vector<8x128xf32>
    %588 = arith.mulf %351, %587 : vector<8x128xf32>
    %c3_297 = arith.constant 3 : index
    %589 = memref.load %arg9[%c3_297] : memref<5xf32, #tpu.memory_space<smem>>
    %590 = vector.broadcast %589 : f32 to vector<8x128xf32>
    %591 = arith.addf %588, %590 : vector<8x128xf32>
    %c3_298 = arith.constant 3 : index
    %c1_299 = arith.constant 1 : index
    %592 = memref.load %arg8[%c3_298, %c1_299] : memref<5x10xf32, #tpu.memory_space<smem>>
    %593 = vector.broadcast %592 : f32 to vector<8x128xf32>
    %594 = arith.mulf %363, %593 : vector<8x128xf32>
    %595 = arith.addf %591, %594 : vector<8x128xf32>
    %c3_300 = arith.constant 3 : index
    %c2_301 = arith.constant 2 : index
    %596 = memref.load %arg8[%c3_300, %c2_301] : memref<5x10xf32, #tpu.memory_space<smem>>
    %597 = vector.broadcast %596 : f32 to vector<8x128xf32>
    %598 = arith.mulf %375, %597 : vector<8x128xf32>
    %599 = arith.addf %595, %598 : vector<8x128xf32>
    %c3_302 = arith.constant 3 : index
    %c3_303 = arith.constant 3 : index
    %600 = memref.load %arg8[%c3_302, %c3_303] : memref<5x10xf32, #tpu.memory_space<smem>>
    %601 = vector.broadcast %600 : f32 to vector<8x128xf32>
    %602 = arith.mulf %387, %601 : vector<8x128xf32>
    %603 = arith.addf %599, %602 : vector<8x128xf32>
    %c3_304 = arith.constant 3 : index
    %c4_305 = arith.constant 4 : index
    %604 = memref.load %arg8[%c3_304, %c4_305] : memref<5x10xf32, #tpu.memory_space<smem>>
    %605 = vector.broadcast %604 : f32 to vector<8x128xf32>
    %606 = arith.mulf %399, %605 : vector<8x128xf32>
    %607 = arith.addf %603, %606 : vector<8x128xf32>
    %c3_306 = arith.constant 3 : index
    %c5_307 = arith.constant 5 : index
    %608 = memref.load %arg8[%c3_306, %c5_307] : memref<5x10xf32, #tpu.memory_space<smem>>
    %609 = vector.broadcast %608 : f32 to vector<8x128xf32>
    %610 = arith.mulf %411, %609 : vector<8x128xf32>
    %611 = arith.addf %607, %610 : vector<8x128xf32>
    %c3_308 = arith.constant 3 : index
    %c6_309 = arith.constant 6 : index
    %612 = memref.load %arg8[%c3_308, %c6_309] : memref<5x10xf32, #tpu.memory_space<smem>>
    %613 = vector.broadcast %612 : f32 to vector<8x128xf32>
    %614 = arith.mulf %423, %613 : vector<8x128xf32>
    %615 = arith.addf %611, %614 : vector<8x128xf32>
    %c3_310 = arith.constant 3 : index
    %c7_311 = arith.constant 7 : index
    %616 = memref.load %arg8[%c3_310, %c7_311] : memref<5x10xf32, #tpu.memory_space<smem>>
    %617 = vector.broadcast %616 : f32 to vector<8x128xf32>
    %618 = arith.mulf %435, %617 : vector<8x128xf32>
    %619 = arith.addf %615, %618 : vector<8x128xf32>
    %c3_312 = arith.constant 3 : index
    %c8_313 = arith.constant 8 : index
    %620 = memref.load %arg8[%c3_312, %c8_313] : memref<5x10xf32, #tpu.memory_space<smem>>
    %621 = vector.broadcast %620 : f32 to vector<8x128xf32>
    %622 = arith.mulf %447, %621 : vector<8x128xf32>
    %623 = arith.addf %619, %622 : vector<8x128xf32>
    %c3_314 = arith.constant 3 : index
    %c9_315 = arith.constant 9 : index
    %624 = memref.load %arg8[%c3_314, %c9_315] : memref<5x10xf32, #tpu.memory_space<smem>>
    %625 = vector.broadcast %624 : f32 to vector<8x128xf32>
    %626 = arith.mulf %459, %625 : vector<8x128xf32>
    %627 = arith.addf %623, %626 : vector<8x128xf32>
    %c4_316 = arith.constant 4 : index
    %c0_317 = arith.constant 0 : index
    %628 = memref.load %arg8[%c4_316, %c0_317] : memref<5x10xf32, #tpu.memory_space<smem>>
    %629 = vector.broadcast %628 : f32 to vector<8x128xf32>
    %630 = arith.mulf %351, %629 : vector<8x128xf32>
    %c4_318 = arith.constant 4 : index
    %631 = memref.load %arg9[%c4_318] : memref<5xf32, #tpu.memory_space<smem>>
    %632 = vector.broadcast %631 : f32 to vector<8x128xf32>
    %633 = arith.addf %630, %632 : vector<8x128xf32>
    %c4_319 = arith.constant 4 : index
    %c1_320 = arith.constant 1 : index
    %634 = memref.load %arg8[%c4_319, %c1_320] : memref<5x10xf32, #tpu.memory_space<smem>>
    %635 = vector.broadcast %634 : f32 to vector<8x128xf32>
    %636 = arith.mulf %363, %635 : vector<8x128xf32>
    %637 = arith.addf %633, %636 : vector<8x128xf32>
    %c4_321 = arith.constant 4 : index
    %c2_322 = arith.constant 2 : index
    %638 = memref.load %arg8[%c4_321, %c2_322] : memref<5x10xf32, #tpu.memory_space<smem>>
    %639 = vector.broadcast %638 : f32 to vector<8x128xf32>
    %640 = arith.mulf %375, %639 : vector<8x128xf32>
    %641 = arith.addf %637, %640 : vector<8x128xf32>
    %c4_323 = arith.constant 4 : index
    %c3_324 = arith.constant 3 : index
    %642 = memref.load %arg8[%c4_323, %c3_324] : memref<5x10xf32, #tpu.memory_space<smem>>
    %643 = vector.broadcast %642 : f32 to vector<8x128xf32>
    %644 = arith.mulf %387, %643 : vector<8x128xf32>
    %645 = arith.addf %641, %644 : vector<8x128xf32>
    %c4_325 = arith.constant 4 : index
    %c4_326 = arith.constant 4 : index
    %646 = memref.load %arg8[%c4_325, %c4_326] : memref<5x10xf32, #tpu.memory_space<smem>>
    %647 = vector.broadcast %646 : f32 to vector<8x128xf32>
    %648 = arith.mulf %399, %647 : vector<8x128xf32>
    %649 = arith.addf %645, %648 : vector<8x128xf32>
    %c4_327 = arith.constant 4 : index
    %c5_328 = arith.constant 5 : index
    %650 = memref.load %arg8[%c4_327, %c5_328] : memref<5x10xf32, #tpu.memory_space<smem>>
    %651 = vector.broadcast %650 : f32 to vector<8x128xf32>
    %652 = arith.mulf %411, %651 : vector<8x128xf32>
    %653 = arith.addf %649, %652 : vector<8x128xf32>
    %c4_329 = arith.constant 4 : index
    %c6_330 = arith.constant 6 : index
    %654 = memref.load %arg8[%c4_329, %c6_330] : memref<5x10xf32, #tpu.memory_space<smem>>
    %655 = vector.broadcast %654 : f32 to vector<8x128xf32>
    %656 = arith.mulf %423, %655 : vector<8x128xf32>
    %657 = arith.addf %653, %656 : vector<8x128xf32>
    %c4_331 = arith.constant 4 : index
    %c7_332 = arith.constant 7 : index
    %658 = memref.load %arg8[%c4_331, %c7_332] : memref<5x10xf32, #tpu.memory_space<smem>>
    %659 = vector.broadcast %658 : f32 to vector<8x128xf32>
    %660 = arith.mulf %435, %659 : vector<8x128xf32>
    %661 = arith.addf %657, %660 : vector<8x128xf32>
    %c4_333 = arith.constant 4 : index
    %c8_334 = arith.constant 8 : index
    %662 = memref.load %arg8[%c4_333, %c8_334] : memref<5x10xf32, #tpu.memory_space<smem>>
    %663 = vector.broadcast %662 : f32 to vector<8x128xf32>
    %664 = arith.mulf %447, %663 : vector<8x128xf32>
    %665 = arith.addf %661, %664 : vector<8x128xf32>
    %c4_335 = arith.constant 4 : index
    %c9_336 = arith.constant 9 : index
    %666 = memref.load %arg8[%c4_335, %c9_336] : memref<5x10xf32, #tpu.memory_space<smem>>
    %667 = vector.broadcast %666 : f32 to vector<8x128xf32>
    %668 = arith.mulf %459, %667 : vector<8x128xf32>
    %669 = arith.addf %665, %668 : vector<8x128xf32>
    %670 = math.tanh %501 : vector<8x128xf32>
    %c0_337 = arith.constant 0 : index
    %c0_338 = arith.constant 0 : index
    %c0_339 = arith.constant 0 : index
    %671 = vector.load %arg10[%c0_337, %c0_338, %c0_339] : memref<5x8x128xf32, #tpu.memory_space<vmem>>, vector<1x8x128xf32>
    %672 = vector.shape_cast %671 : vector<1x8x128xf32> to vector<8x128xf32>
    %673 = vector.shape_cast %670 : vector<8x128xf32> to vector<1x8x128xf32>
    tpu.vector_store %arg10[%c0_337, %c0_338, %c0_339], %673 {strides = array<i32>} : memref<5x8x128xf32, #tpu.memory_space<vmem>>, vector<1x8x128xf32>,
    %674 = math.tanh %543 : vector<8x128xf32>
    %c1_340 = arith.constant 1 : index
    %c0_341 = arith.constant 0 : index
    %c0_342 = arith.constant 0 : index
    %675 = vector.load %arg10[%c1_340, %c0_341, %c0_342] : memref<5x8x128xf32, #tpu.memory_space<vmem>>, vector<1x8x128xf32>
    %676 = vector.shape_cast %675 : vector<1x8x128xf32> to vector<8x128xf32>
    %677 = vector.shape_cast %674 : vector<8x128xf32> to vector<1x8x128xf32>
    tpu.vector_store %arg10[%c1_340, %c0_341, %c0_342], %677 {strides = array<i32>} : memref<5x8x128xf32, #tpu.memory_space<vmem>>, vector<1x8x128xf32>,
    %678 = math.tanh %585 : vector<8x128xf32>
    %c2_343 = arith.constant 2 : index
    %c0_344 = arith.constant 0 : index
    %c0_345 = arith.constant 0 : index
    %679 = vector.load %arg10[%c2_343, %c0_344, %c0_345] : memref<5x8x128xf32, #tpu.memory_space<vmem>>, vector<1x8x128xf32>
    %680 = vector.shape_cast %679 : vector<1x8x128xf32> to vector<8x128xf32>
    %681 = vector.shape_cast %678 : vector<8x128xf32> to vector<1x8x128xf32>
    tpu.vector_store %arg10[%c2_343, %c0_344, %c0_345], %681 {strides = array<i32>} : memref<5x8x128xf32, #tpu.memory_space<vmem>>, vector<1x8x128xf32>,
    %682 = math.tanh %627 : vector<8x128xf32>
    %c3_346 = arith.constant 3 : index
    %c0_347 = arith.constant 0 : index
    %c0_348 = arith.constant 0 : index
    %683 = vector.load %arg10[%c3_346, %c0_347, %c0_348] : memref<5x8x128xf32, #tpu.memory_space<vmem>>, vector<1x8x128xf32>
    %684 = vector.shape_cast %683 : vector<1x8x128xf32> to vector<8x128xf32>
    %685 = vector.shape_cast %682 : vector<8x128xf32> to vector<1x8x128xf32>
    tpu.vector_store %arg10[%c3_346, %c0_347, %c0_348], %685 {strides = array<i32>} : memref<5x8x128xf32, #tpu.memory_space<vmem>>, vector<1x8x128xf32>,
    %686 = math.tanh %669 : vector<8x128xf32>
    %c4_349 = arith.constant 4 : index
    %c0_350 = arith.constant 0 : index
    %c0_351 = arith.constant 0 : index
    %687 = vector.load %arg10[%c4_349, %c0_350, %c0_351] : memref<5x8x128xf32, #tpu.memory_space<vmem>>, vector<1x8x128xf32>
    %688 = vector.shape_cast %687 : vector<1x8x128xf32> to vector<8x128xf32>
    %689 = vector.shape_cast %686 : vector<8x128xf32> to vector<1x8x128xf32>
    tpu.vector_store %arg10[%c4_349, %c0_350, %c0_351], %689 {strides = array<i32>} : memref<5x8x128xf32, #tpu.memory_space<vmem>>, vector<1x8x128xf32>,
    return
  }
  func.func @transform_0(%arg0: i32) -> (i32, i32, i32) {
    %c0_i32 = arith.constant 0 : i32
    %c0_i32_0 = arith.constant 0 : i32
    %c0_i32_1 = arith.constant 0 : i32
    return %c0_i32, %arg0, %c0_i32_0 : i32, i32, i32
  }
  func.func @transform_1(%arg0: i32) -> (i32, i32) {
    %c0_i32 = arith.constant 0 : i32
    %c0_i32_0 = arith.constant 0 : i32
    %c0_i32_1 = arith.constant 0 : i32
    return %c0_i32, %c0_i32_0 : i32, i32
  }
  func.func @transform_2(%arg0: i32) -> i32 {
    %c0_i32 = arith.constant 0 : i32
    %c0_i32_0 = arith.constant 0 : i32
    return %c0_i32 : i32
  }
  func.func @transform_3(%arg0: i32) -> (i32, i32) {
    %c0_i32 = arith.constant 0 : i32
    %c0_i32_0 = arith.constant 0 : i32
    %c0_i32_1 = arith.constant 0 : i32
    return %c0_i32, %c0_i32_0 : i32, i32
  }
  func.func @transform_4(%arg0: i32) -> i32 {
    %c0_i32 = arith.constant 0 : i32
    %c0_i32_0 = arith.constant 0 : i32
    return %c0_i32 : i32
  }
  func.func @transform_5(%arg0: i32) -> (i32, i32) {
    %c0_i32 = arith.constant 0 : i32
    %c0_i32_0 = arith.constant 0 : i32
    %c0_i32_1 = arith.constant 0 : i32
    return %c0_i32, %c0_i32_0 : i32, i32
  }
  func.func @transform_6(%arg0: i32) -> i32 {
    %c0_i32 = arith.constant 0 : i32
    %c0_i32_0 = arith.constant 0 : i32
    return %c0_i32 : i32
  }
  func.func @transform_7(%arg0: i32) -> (i32, i32) {
    %c0_i32 = arith.constant 0 : i32
    %c0_i32_0 = arith.constant 0 : i32
    %c0_i32_1 = arith.constant 0 : i32
    return %c0_i32, %c0_i32_0 : i32, i32
  }
  func.func @transform_8(%arg0: i32) -> i32 {
    %c0_i32 = arith.constant 0 : i32
    %c0_i32_0 = arith.constant 0 : i32
    return %c0_i32 : i32
  }
  func.func @transform_9(%arg0: i32) -> (i32, i32, i32) {
    %c0_i32 = arith.constant 0 : i32
    %c0_i32_0 = arith.constant 0 : i32
    %c0_i32_1 = arith.constant 0 : i32
    return %c0_i32, %arg0, %c0_i32_0 : i32, i32, i32
  }
  func.func @transform_10(%arg0: i32) -> (i32, i32, i32) {
    %c0_i32 = arith.constant 0 : i32
    %c0_i32_0 = arith.constant 0 : i32
    %c0_i32_1 = arith.constant 0 : i32
    return %c0_i32, %arg0, %c0_i32_0 : i32, i32, i32
  }
}

</mosaic_0001>

<bundles_post_ra>
// kernel: tpu_custom_call.1
= control target key start
LH: loop header
LB: loop body
LE: loop exit
PB: predicated region body
PF: predicated region fallthrough
CT: control target
= control target key end

     0   :  { %s1923_s0 = inlined_call_operand.vmem [shape: f32[5,8,128], index: 0, kind: input, shape index: {}]   ;;  %s1924_s1 = inlined_call_operand.vmem [shape: f32[10,5], index: 1, kind: input, shape index: {}]   ;;  %s1925_s2 = inlined_call_operand.vmem [shape: f32[10], index: 2, kind: input, shape index: {}]   ;;  %s1926_s3 = inlined_call_operand.hbm [shape: f32[2,10], index: 3, kind: input, shape index: {}]   ;;  %s1927_s4 = inlined_call_operand.hbm [shape: f32[2], index: 4, kind: input, shape index: {}]   ;;  %s1928_s5 = inlined_call_operand.vmem [shape: f32[10,2], index: 5, kind: input, shape index: {}]   ;;  %s1929_s6 = inlined_call_operand.vmem [shape: f32[10], index: 6, kind: input, shape index: {}]   ;;  %s1930_s7 = inlined_call_operand.vmem [shape: f32[5,10], index: 7, kind: input, shape index: {}]   ;;  %s1931_s8 = inlined_call_operand.vmem [shape: f32[5], index: 8, kind: input, shape index: {}]   ;;  %s1932_s9 = inlined_call_operand.hbm [shape: f32[5,8,128], index: 9, kind: output, shape index: {0}]   ;;  %s1933_s10 = inlined_call_operand.hbm [shape: f32[2,8,128], index: 10, kind: output, shape index: {1}]  }
   0x1   :  { %1938 = sst [smem:[#allocation29_spill]] %s1932_s9 }
   0x2   :  { %1939 = sst [smem:[#allocation30_spill]] %s1933_s10 }
   0x3   :  { %16 = vsyncpa [#allocation5], 0 }
   0x4   :  { %17 = vsyncpa [#allocation7], 0 }
   0x5   :  { %18 = vsyncpa [#allocation4], 0 }
   0x6   :  { %19 = vsyncpa [#allocation10], 0 }
   0x7   :  { %20 = vsyncpa [#allocation13], 0 }
   0x8   :  { %21 = vsyncpa [#allocation16], 0 }
   0x9   :  { %22 = vsyncpa [#allocation3], 0  ;;  %s44_s15 = sshll.u32 %s1925_s2, 4  ;;  %s45_s15 = int_to_ptr.vmem [resolvable:$true] %s44_s15 }
   0xa   :  { %23 = vsyncpa [#allocation19], 0  ;;  %s82_s18 = sshll.u32 %s1929_s6, 4  ;;  %s1014_s19 = scalar_lea.vmem %s45_s15, 16  ;;  %s83_s18 = int_to_ptr.vmem [resolvable:$true] %s82_s18 }
   0xb   :  { %p1015_p0 = scmp.ne.s32.totalorder %s45_s15, %s1014_s19  ;;  %p1019_p1 = scmp.lt.s32.totalorder %s45_s15, %s45_s15 }
   0xc   :  { %p1020_p2 = scmp.lt.s32.totalorder %s1014_s19, %s1014_s19 }
   0xe   :  { %p1021_p3 = por %p1020_p2, %p1019_p1 }
  0x10   :  { %p1022_p4 = pnand %p1021_p3, %p1015_p0 }
  0x12   :  { %1025 = shalt.err (!%p1022_p4)
}
  0x13   :  { %s1160_s20 = smov [#allocation6]   ;;  %s1026_s21 = scalar_lea.vmem %s83_s18, 16 }
  0x14   :  { %47 = dma.vmem_to_smem %s45_s15, 16, %s1160_s20, [#allocation7]  }
  0x15   :  { %p1027_p5 = scmp.ne.s32.totalorder %s83_s18, %s1026_s21  ;;  %p1031_p6 = scmp.lt.s32.totalorder %s83_s18, %s83_s18 }
  0x16   :  { %p1032_p7 = scmp.lt.s32.totalorder %s1026_s21, %s1026_s21 }
  0x18   :  { %p1033_p8 = por %p1032_p7, %p1031_p6 }
  0x1a   :  { %p1034_p9 = pnand %p1033_p8, %p1027_p5 }
  0x1c   :  { %1037 = shalt.err (!%p1034_p9)
}
  0x1d   :  { %s1161_s2 = smov [#allocation12]   ;;  %s31_s23 = sshll.u32 %s1924_s1, 4  ;;  %s32_s23 = int_to_ptr.vmem [resolvable:$true] %s31_s23 }
  0x1e   :  { %85 = dma.vmem_to_smem %s83_s18, 16, %s1161_s2, [#allocation13]  }
  0x1f   :  { %s1038_s24 = scalar_lea.vmem %s32_s23, 256  ;;  %p1043_p11 = scmp.lt.s32.totalorder %s32_s23, %s32_s23 }
  0x20   :  { %p1039_p10 = scmp.ne.s32.totalorder %s32_s23, %s1038_s24  ;;  %p1044_p12 = scmp.lt.s32.totalorder %s1038_s24, %s1038_s24 }
  0x22   :  { %p1045_p13 = por %p1044_p12, %p1043_p11 }
  0x24   :  { %p1046_p0 = pnand %p1045_p13, %p1039_p10 }
  0x26   :  { %1049 = shalt.err (!%p1046_p0)
}
  0x27   :  { %s1162_s25 = smov [#allocation2]   ;;  %s1934_s26 = smov 128  }
  0x28   :  { %s1936_s27 = smov 8   ;;  %s1165_s28 = smov [#allocation8]  }
  0x29   :  { %37 = dma.vmem_to_smem %s32_s23, 256, %s1162_s25, [#allocation5], %s1934_s26, %s1934_s26, %s1936_s27  }
  0x2a   :  { %55 = dma.hbm_to_smem %s1926_s3, 32, %s1165_s28, [#allocation4]  }
  0x2b   :  { %s69_s12 = sshll.u32 %s1928_s5, 4  ;;  %s1166_s13 = smov [#allocation9]   ;;  %s70_s12 = int_to_ptr.vmem [resolvable:$true] %s69_s12 }
  0x2c   :  { %63 = dma.hbm_to_smem %s1927_s4, 16, %s1166_s13, [#allocation10]  }
  0x2d   :  { %s1066_s16 = scalar_lea.vmem %s70_s12, 256  ;;  %p1071_p2 = scmp.lt.s32.totalorder %s70_s12, %s70_s12 }
  0x2e   :  { %p1067_p1 = scmp.ne.s32.totalorder %s70_s12, %s1066_s16  ;;  %p1072_p3 = scmp.lt.s32.totalorder %s1066_s16, %s1066_s16 }
  0x30   :  { %p1073_p4 = por %p1072_p3, %p1071_p2 }
  0x32   :  { %p1074_p5 = pnand %p1073_p4, %p1067_p1 }
  0x34   :  { %1077 = shalt.err (!%p1074_p5)
}
  0x35   :  { %s1167_s17 = smov [#allocation11]   ;;  %s92_s18 = sshll.u32 %s1930_s7, 4  ;;  %s93_s18 = int_to_ptr.vmem [resolvable:$true] %s92_s18 }
  0x36   :  { %75 = dma.vmem_to_smem %s70_s12, 256, %s1167_s17, [#allocation7], %s1934_s26, %s1934_s26, %s1936_s27  }
  0x37   :  { %s102_s20 = sshll.u32 %s1931_s8, 4  ;;  %s1078_s21 = scalar_lea.vmem %s93_s18, 128  ;;  %s103_s20 = int_to_ptr.vmem [resolvable:$true] %s102_s20 }
  0x38   :  { %p1079_p6 = scmp.ne.s32.totalorder %s93_s18, %s1078_s21  ;;  %p1083_p7 = scmp.lt.s32.totalorder %s93_s18, %s93_s18 }
  0x39   :  { %p1084_p8 = scmp.lt.s32.totalorder %s1078_s21, %s1078_s21 }
  0x3b   :  { %p1085_p9 = por %p1084_p8, %p1083_p7 }
  0x3d   :  { %p1086_p10 = pnand %p1085_p9, %p1079_p6 }
  0x3f   :  { %1089 = shalt.err (!%p1086_p10)
}
  0x40   :  { %s1168_s2 = smov [#allocation14]   ;;  %s1090_s6 = scalar_lea.vmem %s103_s20, 16 }
  0x41   :  { %95 = dma.vmem_to_smem %s93_s18, 128, %s1168_s2, [#allocation13]  }
  0x42   :  { %p1091_p11 = scmp.ne.s32.totalorder %s103_s20, %s1090_s6  ;;  %p1095_p12 = scmp.lt.s32.totalorder %s103_s20, %s103_s20 }
  0x43   :  { %p1096_p13 = scmp.lt.s32.totalorder %s1090_s6, %s1090_s6 }
  0x45   :  { %p1097_p0 = por %p1096_p13, %p1095_p12 }
  0x47   :  { %p1098_p1 = pnand %p1097_p0, %p1091_p11 }
  0x49   :  { %1101 = shalt.err (!%p1098_p1)
}
  0x4a   :  { %s1169_s7 = smov [#allocation15]  }
  0x4b   :  { %105 = dma.vmem_to_smem %s103_s20, 16, %s1169_s7, [#allocation16]  }
  0x4c   :  { %1142 = dma.done.wait [#allocation5], 256  }
  0x4d   :  { %1143 = vsyncadd [#allocation5], 4294967040 }
  0x4e   :  { %1144 = dma.done.wait [#allocation7], 16  }
  0x4f   :  { %1145 = vsyncadd [#allocation7], 4294967280 }
  0x50   :  { %1146 = dma.done.wait [#allocation4], 32  }
  0x51   :  { %1147 = vsyncadd [#allocation4], 4294967264 }
  0x52   :  { %1148 = dma.done.wait [#allocation10], 16  }
  0x53   :  { %1149 = vsyncadd [#allocation10], 4294967280 }
  0x54   :  { %1150 = dma.done.wait [#allocation7], 256  }
  0x55   :  { %1151 = vsyncadd [#allocation7], 4294967040 }
  0x56   :  { %1152 = dma.done.wait [#allocation13], 144  }
  0x57   :  { %1153 = vsyncadd [#allocation13], 4294967152 }
  0x58   :  { %1154 = dma.done.wait [#allocation16], 16  }
  0x59   :  { %1155 = vsyncadd [#allocation16], 4294967280 }
  0x5a   :  { %130 = sfence }
  0x5b   :  { %s140_s8 = sld [smem:[#allocation2]]  ;;  %v1298_v0 = vld [vmem:[%s1923_s0] sm:$0xff]  ;;  %v1312_v3 = vld [vmem:[%s1923_s0 + $0x8] sm:$0xff]  ;;  %v1325_v6 = vld [vmem:[%s1923_s0 + $0x10] sm:$0xff] }
  0x5c   :  { %s1257_s22 = sld [smem:[#allocation6]]  ;;  %v1341_v13 = vld [vmem:[%s1923_s0 + $0x18] sm:$0xff]  ;;  %v1357_v22 = vld [vmem:[%s1923_s0 + $0x20] sm:$0xff] }
  0x5d   :  { %s1259_s23 = sld [smem:[#allocation2 + $0x1]] }
  0x5e   :  { %s1261_s24 = sld [smem:[#allocation2 + $0x2]] }
  0x5f   :  { %s1263_s25 = sld [smem:[#allocation2 + $0x3]] }
  0x60   :  { %s1265_s28 = sld [smem:[#allocation2 + $0x4]] }
  0x61   :  { %s1267_s29 = sld [smem:[#allocation2 + $0x80]]  ;;  %v141_v1 = vstv %s140_s8 }
  0x62   :  { %s1269_s30 = sld [smem:[#allocation6 + $0x1]]  ;;  %v142_v2 = vmul.f32 %v141_v1, %v1298_v0  ;;  %v144_v4 = vstv %s1257_s22 }
  0x63   :  { %s1271_s1 = sld [smem:[#allocation2 + $0x81]]  ;;  %v147_v5 = vstv %s1259_s23 }
  0x64   :  { %s1273_s11 = sld [smem:[#allocation2 + $0x82]]  ;;  %v145_v7 = vadd.f32 %v144_v4, %v142_v2  ;;  %v148_v8 = vmul.f32 %v1312_v3, %v147_v5  ;;  %v151_v9 = vstv %s1261_s24 }
  0x65   :  { %s1275_s12 = sld [smem:[#allocation2 + $0x83]]  ;;  %v152_v14 = vmul.f32 %v1325_v6, %v151_v9  ;;  %v155_v15 = vstv %s1263_s25 }
  0x66   :  { %s1277_s13 = sld [smem:[#allocation2 + $0x84]]  ;;  %v149_v18 = vadd.f32 %v148_v8, %v145_v7  ;;  %v159_v23 = vstv %s1265_s28  ;;  %v156_v27 = vmul.f32 %v1341_v13, %v155_v15 }
  0x67   :  { %s1279_s14 = sld [smem:[#allocation2 + $0x100]]  ;;  %v164_v10 = vstv %s1267_s29  ;;  %v1377_v35 = vmul.f32 %v1357_v22, %v159_v23 }
  0x68   :  { %s1281_s15 = sld [smem:[#allocation6 + $0x2]]  ;;  %v165_v16 = vmul.f32 %v164_v10, %v1298_v0  ;;  %v167_v19 = vstv %s1269_s30  ;;  %v153_v43 = vadd.f32 %v152_v14, %v149_v18 }
  0x69   :  { %s1283_s16 = sld [smem:[#allocation2 + $0x101]]  ;;  %v170_v20 = vstv %s1271_s1 }
  0x6a   :  { %s1285_s17 = sld [smem:[#allocation2 + $0x102]]  ;;  %v168_v31 = vadd.f32 %v167_v19, %v165_v16  ;;  %v171_v32 = vmul.f32 %v1312_v3, %v170_v20  ;;  %v174_v36 = vstv %s1273_s11  ;;  %v157_v10 = vadd.f32 %v156_v27, %v153_v43 }
  0x6b   :  { %s1287_s3 = sld [smem:[#allocation2 + $0x103]]  ;;  %v175_v48 = vmul.f32 %v1325_v6, %v174_v36  ;;  %v178_v49 = vstv %s1275_s12 }
  0x6c   :  { %s1289_s5 = sld [smem:[#allocation2 + $0x104]]  ;;  %v172_v47 = vadd.f32 %v171_v32, %v168_v31  ;;  %v179_v59 = vmul.f32 %v1341_v13, %v178_v49  ;;  %v182_v1 = vstv %s1277_s13  ;;  %v1459_v43 = vadd.f32 %v1377_v35, %v157_v10 }
  0x6d   :  { %s1291_s18 = sld [smem:[#allocation2 + $0x180]]  ;;  %v187_v11 = vstv %s1279_s14  ;;  %v183_v20 = vmul.f32 %v1357_v22, %v182_v1 }
  0x6e   :  { %s1293_s19 = sld [smem:[#allocation6 + $0x3]]  ;;  %v188_v21 = vmul.f32 %v187_v11, %v1298_v0  ;;  %v190_v24 = vstv %s1281_s15  ;;  %v176_v63 = vadd.f32 %v175_v48, %v172_v47 }
  0x6f   :  { %s1300_s21 = sld [smem:[#allocation2 + $0x181]]  ;;  %v193_v25 = vstv %s1283_s16 }
  0x70   :  { %s1302_s2 = sld [smem:[#allocation2 + $0x182]]  ;;  %v191_v37 = vadd.f32 %v190_v24, %v188_v21  ;;  %v194_v38 = vmul.f32 %v1312_v3, %v193_v25  ;;  %v197_v39 = vstv %s1285_s17  ;;  %v180_v19 = vadd.f32 %v179_v59, %v176_v63 }
  0x71   :  { %s1304_s6 = sld [smem:[#allocation2 + $0x183]]  ;;  %v198_v52 = vmul.f32 %v1325_v6, %v197_v39  ;;  %v201_v53 = vstv %s1287_s3 }
  0x72   :  { %s1307_s7 = sld [smem:[#allocation2 + $0x184]]  ;;  %v195_v51 = vadd.f32 %v194_v38, %v191_v37  ;;  %v202_v2 = vmul.f32 %v1341_v13, %v201_v53  ;;  %v205_v7 = vstv %s1289_s5 }
  0x73   :  { %s1316_s8 = sld [smem:[#allocation2 + $0x200]]  ;;  %v210_v12 = vstv %s1291_s18  ;;  %v206_v21 = vmul.f32 %v1357_v22, %v205_v7 }
  0x74   :  { %s1318_s4 = sld [smem:[#allocation6 + $0x4]]  ;;  %v211_v26 = vmul.f32 %v210_v12, %v1298_v0  ;;  %v213_v28 = vstv %s1293_s19  ;;  %v199_v5 = vadd.f32 %v198_v52, %v195_v51 }
  0x75   :  { %s1320_s20 = sld [smem:[#allocation2 + $0x201]]  ;;  %v216_v29 = vstv %s1300_s21 }
  0x76   :  { %s1330_s26 = sld [smem:[#allocation2 + $0x202]]  ;;  %v214_v40 = vadd.f32 %v213_v28, %v211_v26  ;;  %v217_v41 = vmul.f32 %v1312_v3, %v216_v29  ;;  %v220_v44 = vstv %s1302_s2  ;;  %v203_v24 = vadd.f32 %v202_v2, %v199_v5 }
  0x77   :  { %s1333_s27 = sld [smem:[#allocation2 + $0x203]]  ;;  %v221_v56 = vmul.f32 %v1325_v6, %v220_v44  ;;  %v224_v60 = vstv %s1304_s6  ;;  %v1461_v44 = vadd.f32 %v183_v20, %v180_v19 }
  0x78   :  { %s1336_s22 = sld [smem:[#allocation2 + $0x204]]  ;;  %v218_v55 = vadd.f32 %v217_v41, %v214_v40  ;;  %v225_v12 = vmul.f32 %v1341_v13, %v224_v60  ;;  %v228_v15 = vstv %s1307_s7  ;;  %v1466_v47 = vadd.f32 %v206_v21, %v203_v24 }
  0x79   :  { %v233_v17 = vstv %s1316_s8  ;;  %s1347_s23 = sld [smem:[#allocation2 + $0x280]]  ;;  %v229_v29 = vmul.f32 %v1357_v22, %v228_v15 }
  0x7a   :  { %s1352_s24 = sld [smem:[#allocation6 + $0x5]]  ;;  %v234_v30 = vmul.f32 %v233_v17, %v1298_v0  ;;  %v236_v33 = vstv %s1318_s4  ;;  %v222_v11 = vadd.f32 %v221_v56, %v218_v55 }
  0x7b   :  { %s1363_s25 = sld [smem:[#allocation2 + $0x281]]  ;;  %v239_v34 = vstv %s1320_s20 }
  0x7c   :  { %s1369_s30 = sld [smem:[#allocation2 + $0x282]]  ;;  %v237_v45 = vadd.f32 %v236_v33, %v234_v30  ;;  %v240_v46 = vmul.f32 %v1312_v3, %v239_v34  ;;  %v243_v50 = vstv %s1330_s26  ;;  %v226_v28 = vadd.f32 %v225_v12, %v222_v11 }
  0x7d   :  { %s1374_s0 = sld [smem:[#allocation2 + $0x283]]  ;;  %v244_v62 = vmul.f32 %v1325_v6, %v243_v50  ;;  %v247_v4 = vstv %s1333_s27 }
  0x7e   :  { %s1381_s28 = sld [smem:[#allocation2 + $0x284]]  ;;  %v241_v61 = vadd.f32 %v240_v46, %v237_v45  ;;  %v248_v17 = vmul.f32 %v1341_v13, %v247_v4  ;;  %v251_v23 = vstv %s1336_s22  ;;  %v1468_v48 = vadd.f32 %v229_v29, %v226_v28 }
  0x7f   :  { %v256_v42 = vstv %s1347_s23  ;;  %s1386_s1 = sld [smem:[#allocation2 + $0x300]]  ;;  %v252_v33 = vmul.f32 %v1357_v22, %v251_v23  ;;  %v208_v4 = vmax.f32 %v1466_v47, 0.0 }
  0x80   :  { %s1390_s11 = sld [smem:[#allocation6 + $0x6]]  ;;  %v257_v54 = vmul.f32 %v256_v42, %v1298_v0  ;;  %v259_v57 = vstv %s1352_s24  ;;  %v245_v16 = vadd.f32 %v244_v62, %v241_v61  ;;  %v185_v62 = vmax.f32 %v1461_v44, 0.0 }
  0x81   :  { %s1395_s15 = sld [smem:[#allocation2 + $0x301]]  ;;  %v262_v58 = vstv %s1363_s25 }
  0x82   :  { %s1400_s16 = sld [smem:[#allocation2 + $0x302]]  ;;  %v260_v8 = vadd.f32 %v259_v57, %v257_v54  ;;  %v263_v9 = vmul.f32 %v1312_v3, %v262_v58  ;;  %v266_v14 = vstv %s1369_s30  ;;  %v249_v32 = vadd.f32 %v248_v17, %v245_v16 }
  0x83   :  { %s1405_s12 = sld [smem:[#allocation2 + $0x303]]  ;;  %v267_v26 = vmul.f32 %v1325_v6, %v266_v14  ;;  %v270_v27 = vstv %s1374_s0  ;;  %v162_v58 = vmax.f32 %v1459_v43, 0.0 }
  0x84   :  { %s1410_s17 = sld [smem:[#allocation2 + $0x304]]  ;;  %v264_v25 = vadd.f32 %v263_v9, %v260_v8  ;;  %v271_v37 = vmul.f32 %v1341_v13, %v270_v27  ;;  %v274_v40 = vstv %s1381_s28  ;;  %v1470_v49 = vadd.f32 %v252_v33, %v249_v32 }
  0x85   :  { %s1415_s3 = sld [smem:[#allocation2 + $0x380]]  ;;  %v279_v18 = vstv %s1386_s1  ;;  %v275_v35 = vmul.f32 %v1357_v22, %v274_v40  ;;  %v231_v9 = vmax.f32 %v1468_v48, 0.0 }
  0x86   :  { %s1419_s18 = sld [smem:[#allocation6 + $0x7]]  ;;  %v280_v30 = vmul.f32 %v279_v18, %v1298_v0  ;;  %v282_v34 = vstv %s1390_s11  ;;  %v268_v39 = vadd.f32 %v267_v26, %v264_v25  ;;  %v254_v10 = vmax.f32 %v1470_v49, 0.0 }
  0x87   :  { %s1423_s13 = sld [smem:[#allocation2 + $0x381]]  ;;  %v285_v36 = vstv %s1395_s15 }
  0x88   :  { %s1428_s5 = sld [smem:[#allocation2 + $0x382]]  ;;  %v283_v45 = vadd.f32 %v282_v34, %v280_v30  ;;  %v286_v46 = vmul.f32 %v1312_v3, %v285_v36  ;;  %v289_v50 = vstv %s1400_s16  ;;  %v272_v54 = vadd.f32 %v271_v37, %v268_v39 }
  0x89   :  { %s1433_s19 = sld [smem:[#allocation2 + $0x383]]  ;;  %v290_v60 = vmul.f32 %v1325_v6, %v289_v50  ;;  %v293_v63 = vstv %s1405_s12 }
  0x8a   :  { %s1437_s21 = sld [smem:[#allocation2 + $0x384]]  ;;  %v287_v59 = vadd.f32 %v286_v46, %v283_v45  ;;  %v1502_v11 = vadd.f32 %v275_v35, %v272_v54  ;;  %v294_v15 = vmul.f32 %v1341_v13, %v293_v63  ;;  %v297_v16 = vstv %s1410_s17 }
  0x8b   :  { %v302_v31 = vstv %s1415_s3  ;;  %s1442_s2 = sld [smem:[#allocation2 + $0x400]] }
  0x8c   :  { %s1447_s6 = sld [smem:[#allocation6 + $0x8]]  ;;  %v303_v38 = vmul.f32 %v302_v31, %v1298_v0  ;;  %v305_v41 = vstv %s1419_s18  ;;  %v291_v14 = vadd.f32 %v290_v60, %v287_v59  ;;  %v298_v31 = vmul.f32 %v1357_v22, %v297_v16 }
  0x8d   :  { %s1451_s7 = sld [smem:[#allocation2 + $0x401]]  ;;  %v308_v42 = vstv %s1423_s13  ;;  %v277_v50 = vmax.f32 %v1502_v11, 0.0 }
  0x8e   :  { %s1456_s8 = sld [smem:[#allocation2 + $0x402]]  ;;  %v306_v51 = vadd.f32 %v305_v41, %v303_v38  ;;  %v309_v52 = vmul.f32 %v1312_v3, %v308_v42  ;;  %v312_v55 = vstv %s1428_s5 }
  0x8f   :  { %s1464_s4 = sld [smem:[#allocation2 + $0x403]]  ;;  %v313_v7 = vmul.f32 %v1325_v6, %v312_v55  ;;  %v316_v12 = vstv %s1433_s19 }
  0x90   :  { %s1473_s20 = sld [smem:[#allocation2 + $0x404]]  ;;  %v310_v5 = vadd.f32 %v309_v52, %v306_v51  ;;  %v317_v24 = vmul.f32 %v1341_v13, %v316_v12  ;;  %v320_v27 = vstv %s1437_s21 }
  0x91   :  { %v325_v53 = vstv %s1442_s2  ;;  %s1478_s26 = sld [smem:[#allocation2 + $0x480]]  ;;  %v321_v39 = vmul.f32 %v1357_v22, %v320_v27 }
  0x92   :  { %v326_v56 = vmul.f32 %v325_v53, %v1298_v0  ;;  %v328_v57 = vstv %s1447_s6  ;;  %s1483_s27 = sld [smem:[#allocation6 + $0x9]]  ;;  %v314_v23 = vadd.f32 %v313_v7, %v310_v5 }
  0x93   :  { %v331_v61 = vstv %s1451_s7  ;;  %s1488_s22 = sld [smem:[#allocation2 + $0x481]] }
  0x94   :  { %v329_v1 = vadd.f32 %v328_v57, %v326_v56  ;;  %v332_v2 = vmul.f32 %v1312_v3, %v331_v61  ;;  %s1493_s9 = sld [smem:[#allocation2 + $0x482]]  ;;  %v335_v8 = vstv %s1456_s8  ;;  %v318_v38 = vadd.f32 %v317_v24, %v314_v23 }
  0x95   :  { %s1498_s10 = sld [smem:[#allocation2 + $0x483]]  ;;  %v336_v19 = vmul.f32 %v1325_v6, %v335_v8  ;;  %v339_v25 = vstv %s1464_s4 }
  0x96   :  { %s1505_s23 = sld [smem:[#allocation2 + $0x484]]  ;;  %v333_v18 = vadd.f32 %v332_v2, %v329_v1  ;;  %v340_v36 = vmul.f32 %v1341_v13, %v339_v25  ;;  %v343_v37 = vstv %s1473_s20  ;;  %v1559_v56 = vadd.f32 %v321_v39, %v318_v38 }
  0x97   :  { %v348_v17 = vstv %s1478_s26  ;;  %s1510_s24 = sld [smem:[#allocation8]]  ;;  %v344_v51 = vmul.f32 %v1357_v22, %v343_v37 }
  0x98   :  { %v349_v20 = vmul.f32 %v348_v17, %v1298_v0  ;;  %v351_v21 = vstv %s1483_s27  ;;  %s1515_s29 = sld [smem:[#allocation9]]  ;;  %v295_v0 = vadd.f32 %v294_v15, %v291_v14  ;;  %v337_v34 = vadd.f32 %v336_v19, %v333_v18 }
  0x99   :  { %v354_v26 = vstv %s1488_s22  ;;  %s1520_s14 = sld [smem:[#allocation8 + $0x1]]  ;;  %v323_v15 = vmax.f32 %v1559_v56, 0.0 }
  0x9a   :  { %v352_v28 = vadd.f32 %v351_v21, %v349_v20  ;;  %v355_v29 = vmul.f32 %v1312_v3, %v354_v26  ;;  %v358_v30 = vstv %s1493_s9  ;;  %s1525_s25 = sld [smem:[#allocation8 + $0x2]]  ;;  %v1548_v35 = vadd.f32 %v298_v31, %v295_v0 }
  0x9b   :  { %v359_v32 = vmul.f32 %v1325_v6, %v358_v30  ;;  %v362_v33 = vstv %s1498_s10  ;;  %s1530_s30 = sld [smem:[#allocation8 + $0x3]]  ;;  %v341_v52 = vadd.f32 %v340_v36, %v337_v34 }
  0x9c   :  { %v356_v3 = vadd.f32 %v355_v29, %v352_v28  ;;  %s1534_s0 = sld [smem:[#allocation8 + $0x4]]  ;;  %v363_v40 = vmul.f32 %v1341_v13, %v362_v33  ;;  %v366_v42 = vstv %s1505_s23 }
  0x9d   :  { %v371_v41 = vstv %s1510_s24  ;;  %s1539_s28 = sld [smem:[#allocation8 + $0x5]]  ;;  %v367_v57 = vmul.f32 %v1357_v22, %v366_v42  ;;  %v300_v22 = vmax.f32 %v1548_v35, 0.0  ;;  %v1574_v7 = vadd.f32 %v344_v51, %v341_v52 }
  0x9e   :  { %v360_v6 = vadd.f32 %v359_v32, %v356_v3  ;;  %v372_v45 = vmul.f32 %v371_v41, %v162_v58  ;;  %v374_v46 = vstv %s1515_s29  ;;  %s1545_s1 = sld [smem:[#allocation8 + $0x6]] }
  0x9f   :  { %v377_v13 = vstv %s1520_s14  ;;  %s1552_s11 = sld [smem:[#allocation8 + $0x7]]  ;;  %v346_v20 = vmax.f32 %v1574_v7, 0.0 }
  0xa0   :  { %v375_v53 = vadd.f32 %v374_v46, %v372_v45  ;;  %v378_v54 = vmul.f32 %v377_v13, %v185_v62  ;;  %v381_v55 = vstv %s1525_s25  ;;  %s1557_s15 = sld [smem:[#allocation8 + $0x8]]  ;;  %v364_v61 = vadd.f32 %v363_v40, %v360_v6 }
  0xa1   :  { %v382_v59 = vmul.f32 %v381_v55, %v208_v4  ;;  %v385_v60 = vstv %s1530_s30  ;;  %s1565_s16 = sld [smem:[#allocation8 + $0x9]] }
  0xa2   :  { %v379_v63 = vadd.f32 %v378_v54, %v375_v53  ;;  %v386_v1 = vmul.f32 %v385_v60, %v231_v9  ;;  %v389_v2 = vstv %s1534_s0  ;;  %s900_s12 = sld [smem:[#allocation8 + $0x80]]  ;;  %v1580_v16 = vadd.f32 %v367_v57, %v364_v61 }
  0xa3   :  { %v393_v5 = vstv %s1539_s28  ;;  %s1571_s17 = sld [smem:[#allocation9 + $0x1]]  ;;  %v390_v12 = vmul.f32 %v389_v2, %v254_v10 }
  0xa4   :  { %v383_v8 = vadd.f32 %v382_v59, %v379_v63  ;;  %s902_s3 = sld [smem:[#allocation8 + $0x81]]  ;;  %v397_v14 = vstv %s1545_s1  ;;  %v394_v18 = vmul.f32 %v393_v5, %v277_v50  ;;  %v369_v28 = vmax.f32 %v1580_v16, 0.0 }
  0xa5   :  { %s903_s18 = sld [smem:[#allocation8 + $0x82]]  ;;  %v401_v19 = vstv %s1552_s11  ;;  %v398_v23 = vmul.f32 %v397_v14, %v300_v22 }
  0xa6   :  { %v387_v17 = vadd.f32 %v386_v1, %v383_v8  ;;  %s904_s13 = sld [smem:[#allocation8 + $0x83]]  ;;  %v405_v25 = vstv %s1557_s15  ;;  %v402_v30 = vmul.f32 %v401_v19, %v323_v15 }
  0xa7   :  { %s1585_s5 = sld [smem:[#allocation8 + $0x84]]  ;;  %v409_v31 = vstv %s1565_s16 }
  0xa8   :  { %v391_v21 = vadd.f32 %v390_v12, %v387_v17  ;;  %v413_v24 = vstv %s900_s12  ;;  %s1588_s19 = sld [smem:[#allocation8 + $0x85]] }
  0xa9   :  { %v414_v26 = vmul.f32 %v413_v24, %v162_v58  ;;  %v416_v27 = vstv %s1571_s17  ;;  %s1594_s21 = sld [smem:[#allocation8 + $0x86]]  ;;  %v406_v58 = vmul.f32 %v405_v25, %v346_v20 }
  0xaa   :  { %v395_v29 = vadd.f32 %v394_v18, %v391_v21  ;;  %v419_v0 = vstv %s902_s3  ;;  %s1597_s2 = sld [smem:[#allocation8 + $0x87]] }
  0xab   :  { %v417_v32 = vadd.f32 %v416_v27, %v414_v26  ;;  %v420_v33 = vmul.f32 %v419_v0, %v185_v62  ;;  %v423_v34 = vstv %s903_s18  ;;  %s1602_s6 = sld [smem:[#allocation8 + $0x88]]  ;;  %v410_v62 = vmul.f32 %v409_v31, %v369_v28 }
  0xac   :  { %v399_v43 = vadd.f32 %v398_v23, %v395_v29  ;;  %v424_v36 = vmul.f32 %v423_v34, %v208_v4  ;;  %v427_v37 = vstv %s904_s13  ;;  %s1606_s7 = sld [smem:[#allocation8 + $0x89]] }
  0xad   :  { %v421_v3 = vadd.f32 %v420_v33, %v417_v32  ;;  %v428_v38 = vmul.f32 %v427_v37, %v231_v9  ;;  %v431_v39 = vstv %s1585_s5  ;;  %s1611_s8 = sld [smem:[#allocation11]] }
  0xae   :  { %v403_v44 = vadd.f32 %v402_v30, %v399_v43  ;;  %v435_v40 = vstv %s1588_s19  ;;  %s1614_s4 = sld [smem:[#allocation12]]  ;;  %v432_v4 = vmul.f32 %v431_v39, %v254_v10 }
  0xaf   :  { %v425_v47 = vadd.f32 %v424_v36, %v421_v3  ;;  %s1618_s20 = sld [smem:[#allocation11 + $0x1]]  ;;  %v439_v6 = vstv %s1594_s21  ;;  %v436_v9 = vmul.f32 %v435_v40, %v277_v50 }
  0xb0   :  { %v407_v41 = vadd.f32 %v406_v58, %v403_v44  ;;  %s1621_s26 = sld [smem:[#allocation11 + $0x80]]  ;;  %v443_v45 = vstv %s1597_s2  ;;  %v440_v10 = vmul.f32 %v439_v6, %v300_v22 }
  0xb1   :  { %v429_v48 = vadd.f32 %v428_v38, %v425_v47  ;;  %s1625_s27 = sld [smem:[#allocation12 + $0x1]]  ;;  %v447_v46 = vstv %s1602_s6  ;;  %v444_v51 = vmul.f32 %v443_v45, %v323_v15 }
  0xb2   :  { %v1627_v42 = vadd.f32 %v410_v62, %v407_v41  ;;  %s1630_s22 = sld [smem:[#allocation11 + $0x81]]  ;;  %v451_v11 = vstv %s1606_s7  ;;  %v448_v13 = vmul.f32 %v447_v46, %v346_v20 }
  0xb3   :  { %v433_v49 = vadd.f32 %v432_v4, %v429_v48  ;;  %s1632_s9 = sld [smem:[#allocation11 + $0x100]]  ;;  %v452_v53 = vmul.f32 %v451_v11, %v369_v28  ;;  %v458_v56 = vstv %s1611_s8 }
  0xb4   :  { %454 = vst [vmem:[#allocation18] sm:$0xff] %v1627_v42  ;;  %s1636_s10 = sld [smem:[#allocation12 + $0x2]]  ;;  %v459_v60 = vmul.f32 %v458_v56, %v1627_v42  ;;  %v461_v63 = vstv %s1614_s4 }
  0xb5   :  { %v437_v35 = vadd.f32 %v436_v9, %v433_v49  ;;  %s1638_s23 = sld [smem:[#allocation11 + $0x101]]  ;;  %v464_v5 = vstv %s1618_s20 }
  0xb6   :  { %s1641_s24 = sld [smem:[#allocation11 + $0x180]]  ;;  %v469_v57 = vstv %s1621_s26  ;;  %v462_v17 = vadd.f32 %v461_v63, %v459_v60 }
  0xb7   :  { %v441_v50 = vadd.f32 %v440_v10, %v437_v35  ;;  %s1643_s29 = sld [smem:[#allocation12 + $0x3]]  ;;  %v470_v1 = vmul.f32 %v469_v57, %v1627_v42  ;;  %v472_v22 = vstv %s1625_s27 }
  0xb8   :  { %s1645_s14 = sld [smem:[#allocation11 + $0x181]]  ;;  %v475_v7 = vstv %s1630_s22 }
  0xb9   :  { %v445_v52 = vadd.f32 %v444_v51, %v441_v50  ;;  %s1647_s25 = sld [smem:[#allocation11 + $0x200]]  ;;  %v480_v59 = vstv %s1632_s9  ;;  %v473_v23 = vadd.f32 %v472_v22, %v470_v1 }
  0xba   :  { %s1649_s30 = sld [smem:[#allocation12 + $0x4]]  ;;  %v481_v8 = vmul.f32 %v480_v59, %v1627_v42  ;;  %v483_v12 = vstv %s1636_s10 }
  0xbb   :  { %v449_v54 = vadd.f32 %v448_v13, %v445_v52  ;;  %s1651_s0 = sld [smem:[#allocation11 + $0x201]]  ;;  %v486_v14 = vstv %s1638_s23 }
  0xbc   :  { %s1653_s28 = sld [smem:[#allocation11 + $0x280]]  ;;  %v491_v61 = vstv %s1641_s24  ;;  %v484_v27 = vadd.f32 %v483_v12, %v481_v8 }
  0xbd   :  { %v1655_v55 = vadd.f32 %v452_v53, %v449_v54  ;;  %s1658_s1 = sld [smem:[#allocation12 + $0x5]]  ;;  %v492_v15 = vmul.f32 %v491_v61, %v1627_v42  ;;  %v494_v18 = vstv %s1643_s29 }
  0xbe   :  { %s1661_s11 = sld [smem:[#allocation11 + $0x281]]  ;;  %v497_v19 = vstv %s1645_s14 }
  0xbf   :  { %456 = vst [vmem:[#allocation18 + $0x8] sm:$0xff] %v1655_v55  ;;  %s1665_s15 = sld [smem:[#allocation11 + $0x300]]  ;;  %v502_v2 = vstv %s1647_s25  ;;  %v465_v21 = vmul.f32 %v464_v5, %v1655_v55  ;;  %v476_v26 = vmul.f32 %v475_v7, %v1655_v55  ;;  %v487_v28 = vmul.f32 %v486_v14, %v1655_v55 }
  0xc0   :  { %s1669_s16 = sld [smem:[#allocation12 + $0x6]]  ;;  %v503_v20 = vmul.f32 %v502_v2, %v1627_v42  ;;  %v505_v24 = vstv %s1649_s30  ;;  %v495_v30 = vadd.f32 %v494_v18, %v492_v15  ;;  %v498_v0 = vmul.f32 %v497_v19, %v1655_v55 }
  0xc1   :  { %s1674_s12 = sld [smem:[#allocation11 + $0x301]]  ;;  %v508_v25 = vstv %s1651_s0  ;;  %v466_v58 = vadd.f32 %v465_v21, %v462_v17  ;;  %v477_v36 = vadd.f32 %v476_v26, %v473_v23  ;;  %v488_v39 = vadd.f32 %v487_v28, %v484_v27 }
  0xc2   :  { %s1680_s17 = sld [smem:[#allocation11 + $0x380]]  ;;  %v513_v16 = vstv %s1653_s28  ;;  %v506_v33 = vadd.f32 %v505_v24, %v503_v20  ;;  %v509_v34 = vmul.f32 %v508_v25, %v1655_v55  ;;  %v499_v44 = vadd.f32 %v498_v0, %v495_v30 }
  0xc3   :  { %s1686_s3 = sld [smem:[#allocation12 + $0x7]]  ;;  %v514_v29 = vmul.f32 %v513_v16, %v1627_v42  ;;  %v516_v31 = vstv %s1658_s1  ;;  %v1726_v6 = vmax.f32 %v466_v58, 0.0  ;;  %v1732_v45 = vmax.f32 %v477_v36, 0.0 }
  0xc4   :  { %s1691_s18 = sld [smem:[#allocation11 + $0x381]]  ;;  %v519_v32 = vstv %s1661_s11  ;;  %v510_v40 = vadd.f32 %v509_v34, %v506_v33  ;;  %v1738_v35 = vmax.f32 %v488_v39, 0.0  ;;  %v1744_v13 = vmax.f32 %v499_v44, 0.0 }
  0xc5   :  { %s1696_s13 = sld [smem:[#allocation11 + $0x400]]  ;;  %v524_v43 = vstv %s1665_s15  ;;  %v517_v37 = vadd.f32 %v516_v31, %v514_v29  ;;  %v520_v3 = vmul.f32 %v519_v32, %v1655_v55 }
  0xc6   :  { %s1701_s5 = sld [smem:[#allocation12 + $0x8]]  ;;  %v525_v62 = vmul.f32 %v524_v43, %v1627_v42  ;;  %v527_v47 = vstv %s1669_s16  ;;  %v1746_v52 = vmax.f32 %v510_v40, 0.0 }
  0xc7   :  { %s1706_s19 = sld [smem:[#allocation11 + $0x401]]  ;;  %v530_v4 = vstv %s1674_s12  ;;  %v521_v49 = vadd.f32 %v520_v3, %v517_v37 }
  0xc8   :  { %s1710_s21 = sld [smem:[#allocation11 + $0x480]]  ;;  %v535_v38 = vstv %s1680_s17  ;;  %v528_v51 = vadd.f32 %v527_v47, %v525_v62  ;;  %v531_v11 = vmul.f32 %v530_v4, %v1655_v55 }
  0xc9   :  { %s1712_s2 = sld [smem:[#allocation12 + $0x9]]  ;;  %v536_v48 = vmul.f32 %v535_v38, %v1627_v42  ;;  %v538_v10 = vstv %s1686_s3  ;;  %v1757_v61 = vmax.f32 %v521_v49, 0.0 }
  0xca   :  { %s1716_s6 = sld [smem:[#allocation11 + $0x481]]  ;;  %v541_v9 = vstv %s1691_s18  ;;  %v532_v5 = vadd.f32 %v531_v11, %v528_v51 }
  0xcb   :  { %s1719_s7 = sld [smem:[#allocation14]]  ;;  %v546_v41 = vstv %s1696_s13  ;;  %v542_v53 = vmul.f32 %v541_v9, %v1655_v55  ;;  %v539_v56 = vadd.f32 %v538_v10, %v536_v48 }
  0xcc   :  { %s1724_s8 = sld [smem:[#allocation15]]  ;;  %v547_v50 = vmul.f32 %v546_v41, %v1627_v42  ;;  %v549_v54 = vstv %s1701_s5  ;;  %v1783_v26 = vmax.f32 %v532_v5, 0.0 }
  0xcd   :  { %s1730_s4 = sld [smem:[#allocation14 + $0x1]]  ;;  %v552_v57 = vstv %s1706_s19  ;;  %v543_v16 = vadd.f32 %v542_v53, %v539_v56 }
  0xce   :  { %v557_v46 = vstv %s1710_s21  ;;  %s1736_s20 = sld [smem:[#allocation14 + $0x2]]  ;;  %v550_v22 = vadd.f32 %v549_v54, %v547_v50 }
  0xcf   :  { %s1742_s26 = sld [smem:[#allocation14 + $0x3]]  ;;  %v558_v59 = vmul.f32 %v557_v46, %v1627_v42  ;;  %v560_v63 = vstv %s1712_s2  ;;  %v553_v42 = vmul.f32 %v552_v57, %v1655_v55 }
  0xd0   :  { %s1750_s27 = sld [smem:[#allocation14 + $0x4]]  ;;  %v563_v7 = vstv %s1716_s6 }
  0xd1   :  { %v568_v60 = vstv %s1719_s7  ;;  %s1755_s22 = sld [smem:[#allocation14 + $0x5]]  ;;  %v561_v17 = vadd.f32 %v560_v63, %v558_v59  ;;  %v564_v20 = vmul.f32 %v563_v7, %v1655_v55  ;;  %v554_v27 = vadd.f32 %v553_v42, %v550_v22 }
  0xd2   :  { %v569_v1 = vmul.f32 %v568_v60, %v1726_v6  ;;  %v571_v2 = vstv %s1724_s8  ;;  %s1762_s9 = sld [smem:[#allocation14 + $0x6]]  ;;  %v1787_v55 = vmax.f32 %v543_v16, 0.0 }
  0xd3   :  { %v574_v8 = vstv %s1730_s4  ;;  %s1766_s10 = sld [smem:[#allocation14 + $0x7]]  ;;  %v565_v0 = vadd.f32 %v564_v20, %v561_v17  ;;  %v1793_v34 = vmax.f32 %v554_v27, 0.0 }
  0xd4   :  { %v572_v12 = vadd.f32 %v571_v2, %v569_v1  ;;  %v575_v14 = vmul.f32 %v574_v8, %v1732_v45  ;;  %v578_v15 = vstv %s1736_s20  ;;  %s1771_s23 = sld [smem:[#allocation14 + $0x8]] }
  0xd5   :  { %v579_v18 = vmul.f32 %v578_v15, %v1738_v35  ;;  %v582_v19 = vstv %s1742_s26  ;;  %s1775_s24 = sld [smem:[#allocation14 + $0x9]]  ;;  %v1803_v39 = vmax.f32 %v565_v0, 0.0 }
  0xd6   :  { %v576_v21 = vadd.f32 %v575_v14, %v572_v12  ;;  %v583_v23 = vmul.f32 %v582_v19, %v1744_v13  ;;  %v586_v24 = vstv %s1750_s27  ;;  %s948_s29 = sld [smem:[#allocation14 + $0x80]] }
  0xd7   :  { %v590_v25 = vstv %s1755_s22  ;;  %s1781_s14 = sld [smem:[#allocation15 + $0x1]]  ;;  %v587_v29 = vmul.f32 %v586_v24, %v1746_v52 }
  0xd8   :  { %v580_v28 = vadd.f32 %v579_v18, %v576_v21  ;;  %s950_s25 = sld [smem:[#allocation14 + $0x81]]  ;;  %v594_v30 = vstv %s1762_s9  ;;  %v591_v32 = vmul.f32 %v590_v25, %v1757_v61 }
  0xd9   :  { %s951_s30 = sld [smem:[#allocation14 + $0x82]]  ;;  %v598_v33 = vstv %s1766_s10  ;;  %v595_v58 = vmul.f32 %v594_v30, %v1783_v26 }
  0xda   :  { %v584_v31 = vadd.f32 %v583_v23, %v580_v28  ;;  %s952_s0 = sld [smem:[#allocation14 + $0x83]]  ;;  %v602_v37 = vstv %s1771_s23  ;;  %v599_v62 = vmul.f32 %v598_v33, %v1787_v55 }
  0xdb   :  { %s1791_s28 = sld [smem:[#allocation14 + $0x84]]  ;;  %v606_v47 = vstv %s1775_s24  ;;  %v603_v49 = vmul.f32 %v602_v37, %v1793_v34 }
  0xdc   :  { %v588_v43 = vadd.f32 %v587_v29, %v584_v31  ;;  %v610_v36 = vstv %s948_s29  ;;  %s1796_s1 = sld [smem:[#allocation14 + $0x85]]  ;;  %v607_v54 = vmul.f32 %v606_v47, %v1803_v39 }
  0xdd   :  { %v611_v3 = vmul.f32 %v610_v36, %v1726_v6  ;;  %v613_v38 = vstv %s1781_s14  ;;  %s1801_s11 = sld [smem:[#allocation14 + $0x86]] }
  0xde   :  { %v592_v44 = vadd.f32 %v591_v32, %v588_v43  ;;  %v616_v40 = vstv %s950_s25  ;;  %s1806_s15 = sld [smem:[#allocation14 + $0x87]] }
  0xdf   :  { %v614_v4 = vadd.f32 %v613_v38, %v611_v3  ;;  %v617_v41 = vmul.f32 %v616_v40, %v1732_v45  ;;  %v620_v48 = vstv %s951_s30  ;;  %s1810_s16 = sld [smem:[#allocation14 + $0x88]] }
  0xe0   :  { %v596_v9 = vadd.f32 %v595_v58, %v592_v44  ;;  %v621_v10 = vmul.f32 %v620_v48, %v1738_v35  ;;  %v624_v46 = vstv %s952_s0  ;;  %s1814_s12 = sld [smem:[#allocation14 + $0x89]] }
  0xe1   :  { %v618_v51 = vadd.f32 %v617_v41, %v614_v4  ;;  %v625_v11 = vmul.f32 %v624_v46, %v1744_v13  ;;  %v628_v50 = vstv %s1791_s28  ;;  %s959_s17 = sld [smem:[#allocation14 + $0x100]] }
  0xe2   :  { %v600_v53 = vadd.f32 %v599_v62, %v596_v9  ;;  %v632_v56 = vstv %s1796_s1  ;;  %s960_s3 = sld [smem:[#allocation15 + $0x2]]  ;;  %v629_v59 = vmul.f32 %v628_v50, %v1746_v52 }
  0xe3   :  { %v622_v57 = vadd.f32 %v621_v10, %v618_v51  ;;  %s961_s18 = sld [smem:[#allocation14 + $0x101]]  ;;  %v636_v63 = vstv %s1801_s11  ;;  %v633_v2 = vmul.f32 %v632_v56, %v1757_v61 }
  0xe4   :  { %v604_v60 = vadd.f32 %v603_v49, %v600_v53  ;;  %s962_s13 = sld [smem:[#allocation14 + $0x102]]  ;;  %v640_v22 = vstv %s1806_s15  ;;  %v637_v8 = vmul.f32 %v636_v63, %v1783_v26 }
  0xe5   :  { %v626_v1 = vadd.f32 %v625_v11, %v622_v57  ;;  %s963_s5 = sld [smem:[#allocation14 + $0x103]]  ;;  %v644_v12 = vstv %s1810_s16  ;;  %v641_v17 = vmul.f32 %v640_v22, %v1787_v55 }
  0xe6   :  { %v608_v5 = vadd.f32 %v607_v54, %v604_v60  ;;  %s1824_s19 = sld [smem:[#allocation14 + $0x104]]  ;;  %v648_v19 = vstv %s1814_s12  ;;  %v645_v25 = vmul.f32 %v644_v12, %v1793_v34 }
  0xe7   :  { %v630_v7 = vadd.f32 %v629_v59, %v626_v1  ;;  %v652_v42 = vstv %s959_s17  ;;  %s1827_s21 = sld [smem:[#allocation14 + $0x105]]  ;;  %v649_v32 = vmul.f32 %v648_v19, %v1803_v39 }
  0xe8   :  { %v653_v14 = vmul.f32 %v652_v42, %v1726_v6  ;;  %v655_v15 = vstv %s960_s3  ;;  %s1831_s2 = sld [smem:[#allocation14 + $0x106]]  ;;  %1004 = vtanh.f32 %v608_v5  ;;  %s1170_s3 = smov [#allocation18]  }
  0xe9   :  { %v634_v16 = vadd.f32 %v633_v2, %v630_v7  ;;  %v658_v18 = vstv %s961_s18  ;;  %s1834_s6 = sld [smem:[#allocation14 + $0x107]]  ;;  %s808_s18 = sshll.u32 %s1170_s3, 4  ;;  %s809_s18 = int_to_ptr.vmem [resolvable:$true] %s808_s18 }
  0xea   :  { %v656_v20 = vadd.f32 %v655_v15, %v653_v14  ;;  %v659_v21 = vmul.f32 %v658_v18, %v1732_v45  ;;  %v662_v23 = vstv %s962_s13  ;;  %s1838_s7 = sld [smem:[#allocation14 + $0x108]]  ;;  %p1107_p3 = scmp.lt.s32.totalorder %s809_s18, %s809_s18 }
  0xeb   :  { %v638_v24 = vadd.f32 %v637_v8, %v634_v16  ;;  %v663_v27 = vmul.f32 %v662_v23, %v1738_v35  ;;  %v666_v28 = vstv %s963_s5  ;;  %s1842_s8 = sld [smem:[#allocation14 + $0x109]]  ;;  %s1102_s5 = scalar_lea.vmem %s809_s18, 256 }
  0xec   :  { %v660_v29 = vadd.f32 %v659_v21, %v656_v20  ;;  %v667_v30 = vmul.f32 %v666_v28, %v1744_v13  ;;  %v670_v0 = vstv %s1824_s19  ;;  %s970_s4 = sld [smem:[#allocation14 + $0x180]]  ;;  %p1103_p2 = scmp.ne.s32.totalorder %s809_s18, %s1102_s5 }
  0xed   :  { %v642_v31 = vadd.f32 %v641_v17, %v638_v24  ;;  %v674_v33 = vstv %s1827_s21  ;;  %s971_s20 = sld [smem:[#allocation15 + $0x3]]  ;;  %v671_v58 = vmul.f32 %v670_v0, %v1746_v52  ;;  %p1108_p4 = scmp.lt.s32.totalorder %s1102_s5, %s1102_s5 }
  0xee   :  { %v664_v43 = vadd.f32 %v663_v27, %v660_v29  ;;  %s972_s26 = sld [smem:[#allocation14 + $0x181]]  ;;  %v678_v37 = vstv %s1831_s2  ;;  %v675_v38 = vmul.f32 %v674_v33, %v1757_v61 }
  0xef   :  { %v646_v36 = vadd.f32 %v645_v25, %v642_v31  ;;  %s973_s27 = sld [smem:[#allocation14 + $0x182]]  ;;  %v682_v62 = vstv %s1834_s6  ;;  %v679_v47 = vmul.f32 %v678_v37, %v1783_v26  ;;  %p1109_p5 = por %p1108_p4, %p1107_p3 }
  0xf0   :  { %v668_v3 = vadd.f32 %v667_v30, %v664_v43  ;;  %s974_s22 = sld [smem:[#allocation14 + $0x183]]  ;;  %v686_v41 = vstv %s1838_s7  ;;  %v683_v10 = vmul.f32 %v682_v62, %v1787_v55 }
  0xf1   :  { %v650_v44 = vadd.f32 %v649_v32, %v646_v36  ;;  %s1852_s9 = sld [smem:[#allocation14 + $0x184]]  ;;  %v690_v11 = vstv %s1842_s8  ;;  %v687_v57 = vmul.f32 %v686_v41, %v1793_v34  ;;  %p1110_p6 = pnand %p1109_p5, %p1103_p2 }
  0xf2   :  { %v672_v40 = vadd.f32 %v671_v58, %v668_v3  ;;  %v694_v4 = vstv %s970_s4  ;;  %s1855_s10 = sld [smem:[#allocation14 + $0x185]]  ;;  %v691_v22 = vmul.f32 %v690_v11, %v1803_v39 }
  0xf3   :  { %v695_v48 = vmul.f32 %v694_v4, %v1726_v6  ;;  %v697_v9 = vstv %s971_s20  ;;  %s1859_s23 = sld [smem:[#allocation14 + $0x186]]  ;;  %1006 = vtanh.f32 %v650_v44 }
  0xf4   :  { %v676_v49 = vadd.f32 %v675_v38, %v672_v40  ;;  %v700_v46 = vstv %s972_s26  ;;  %s1862_s24 = sld [smem:[#allocation14 + $0x187]] }
  0xf5   :  { %v1005_v51 = vpop.eup %1004  ;;  %v698_v50 = vadd.f32 %v697_v9, %v695_v48  ;;  %v701_v53 = vmul.f32 %v700_v46, %v1732_v45  ;;  %v704_v54 = vstv %s973_s27  ;;  %s1866_s29 = sld [smem:[#allocation14 + $0x188]] }
  0xf6   :  { %v680_v56 = vadd.f32 %v679_v47, %v676_v49  ;;  %v705_v59 = vmul.f32 %v704_v54, %v1738_v35  ;;  %v708_v60 = vstv %s974_s22  ;;  %s1870_s14 = sld [smem:[#allocation14 + $0x189]]  ;;  %778 = vst [vmem:[#allocation17] sm:$0xff] %v1005_v51 }
  0xf7   :  { %v702_v63 = vadd.f32 %v701_v53, %v698_v50  ;;  %v709_v1 = vmul.f32 %v708_v60, %v1744_v13  ;;  %v712_v2 = vstv %s1852_s9  ;;  %s981_s25 = sld [smem:[#allocation14 + $0x200]] }
  0xf8   :  { %v684_v5 = vadd.f32 %v683_v10, %v680_v56  ;;  %v716_v7 = vstv %s1855_s10  ;;  %s982_s30 = sld [smem:[#allocation15 + $0x4]]  ;;  %v713_v42 = vmul.f32 %v712_v2, %v1746_v52 }
  0xf9   :  { %v706_v8 = vadd.f32 %v705_v59, %v702_v63  ;;  %s983_s0 = sld [smem:[#allocation14 + $0x201]]  ;;  %v720_v14 = vstv %s1859_s23  ;;  %v717_v16 = vmul.f32 %v716_v7, %v1757_v61 }
  0xfa   :  { %v688_v12 = vadd.f32 %v687_v57, %v684_v5  ;;  %s984_s28 = sld [smem:[#allocation14 + $0x202]]  ;;  %v724_v18 = vstv %s1862_s24  ;;  %v721_v20 = vmul.f32 %v720_v14, %v1783_v26 }
  0xfb   :  { %v710_v15 = vadd.f32 %v709_v1, %v706_v8  ;;  %s985_s1 = sld [smem:[#allocation14 + $0x203]]  ;;  %v728_v23 = vstv %s1866_s29  ;;  %v725_v28 = vmul.f32 %v724_v18, %v1787_v55 }
  0xfc   :  { %v692_v17 = vadd.f32 %v691_v22, %v688_v12  ;;  %s1880_s11 = sld [smem:[#allocation14 + $0x204]]  ;;  %v732_v0 = vstv %s1870_s14 }
  0xfd   :  { %v714_v19 = vadd.f32 %v713_v42, %v710_v15  ;;  %v736_v21 = vstv %s981_s25  ;;  %s1883_s15 = sld [smem:[#allocation14 + $0x205]] }
  0xfe   :  { %v737_v24 = vmul.f32 %v736_v21, %v1726_v6  ;;  %v739_v25 = vstv %s982_s30  ;;  %s1887_s16 = sld [smem:[#allocation14 + $0x206]]  ;;  %1008 = vtanh.f32 %v692_v17  ;;  %v729_v6 = vmul.f32 %v728_v23, %v1793_v34 }
  0xff   :  { %v718_v27 = vadd.f32 %v717_v16, %v714_v19  ;;  %v742_v29 = vstv %s983_s0  ;;  %s1890_s12 = sld [smem:[#allocation14 + $0x207]] }
 0x100   :  { %v1007_v30 = vpop.eup %1006  ;;  %v740_v31 = vadd.f32 %v739_v25, %v737_v24  ;;  %v743_v32 = vmul.f32 %v742_v29, %v1732_v45  ;;  %v746_v33 = vstv %s984_s28  ;;  %s1896_s17 = sld [smem:[#allocation14 + $0x208]]  ;;  %v733_v45 = vmul.f32 %v732_v0, %v1803_v39 }
 0x101   :  { %v722_v43 = vadd.f32 %v721_v20, %v718_v27  ;;  %v747_v58 = vmul.f32 %v746_v33, %v1738_v35  ;;  %v750_v36 = vstv %s985_s1  ;;  %781 = vst [vmem:[#allocation17 + $0x8] sm:$0xff] %v1007_v30  ;;  %s991_s13 = sld [smem:[#allocation14 + $0x209]] }
 0x102   :  { %v744_v37 = vadd.f32 %v743_v32, %v740_v31  ;;  %v751_v3 = vmul.f32 %v750_v36, %v1744_v13  ;;  %v754_v38 = vstv %s1880_s11 }
 0x103   :  { %v726_v44 = vadd.f32 %v725_v28, %v722_v43  ;;  %v758_v62 = vstv %s1883_s15  ;;  %v755_v35 = vmul.f32 %v754_v38, %v1746_v52 }
 0x104   :  { %v748_v40 = vadd.f32 %v747_v58, %v744_v37  ;;  %v762_v4 = vstv %s1887_s16  ;;  %v759_v48 = vmul.f32 %v758_v62, %v1757_v61 }
 0x105   :  { %v730_v47 = vadd.f32 %v729_v6, %v726_v44  ;;  %v766_v13 = vstv %s1890_s12  ;;  %v763_v10 = vmul.f32 %v762_v4, %v1783_v26 }
 0x106   :  { %v752_v41 = vadd.f32 %v751_v3, %v748_v40 }
 0x107   :  { %v734_v9 = vadd.f32 %v733_v45, %v730_v47 }
 0x108   :  { %v756_v49 = vadd.f32 %v755_v35, %v752_v41 }
 0x109   :  { %1113 = shalt.err (!%p1110_p6)
}
 0x10a   :  { %s1940_s19 = smov 8   ;;  %s1941_s21 = smov 128   ;;  %v770_v52 = vstv %s1896_s17  ;;  %1010 = vtanh.f32 %v734_v9  ;;  %v760_v61 = vadd.f32 %v759_v48, %v756_v49  ;;  %v767_v26 = vmul.f32 %v766_v13, %v1787_v55 }
 0x10b   :  { %s1942_s7 = sld [smem:[#allocation30_spill]]  ;;  %v1009_v46 = vpop.eup %1008  ;;  %v774_v51 = vstv %s991_s13  ;;  %v771_v50 = vmul.f32 %v770_v52, %v1793_v34  ;;  %s1171_s8 = smov [#allocation17]  }
 0x10c   :  { %v764_v11 = vadd.f32 %v763_v10, %v760_v61  ;;  %784 = vst [vmem:[#allocation17 + $0x10] sm:$0xff] %v1009_v46  ;;  %v775_v54 = vmul.f32 %v774_v51, %v1803_v39  ;;  %s796_s4 = sshll.u32 %s1171_s8, 4  ;;  %s797_s4 = int_to_ptr.vmem [resolvable:$true] %s796_s4 }
 0x10d   :  { %s1122_s20 = scalar_lea.vmem %s797_s4, 640  ;;  %p1127_p8 = scmp.lt.s32.totalorder %s797_s4, %s797_s4 }
 0x10e   :  { %v768_v53 = vadd.f32 %v767_v26, %v764_v11  ;;  %p1123_p7 = scmp.ne.s32.totalorder %s797_s4, %s1122_s20  ;;  %p1128_p9 = scmp.lt.s32.totalorder %s1122_s20, %s1122_s20 }
 0x110   :  { %v772_v56 = vadd.f32 %v771_v50, %v768_v53  ;;  %p1129_p10 = por %p1128_p9, %p1127_p8 }
 0x111   :  { %814 = dma.vmem_to_hbm [thread:$0]  %s809_s18, 256, %s1942_s7, [#allocation19], %s1941_s21, %s1941_s21, %s1940_s19  }
 0x112   :  { %v776_v57 = vadd.f32 %v775_v54, %v772_v56  ;;  %p1130_p11 = pnand %p1129_p10, %p1123_p7 }
 0x114   :  { %1012 = vtanh.f32 %v776_v57 }
 0x117   :  { %v1011_v59 = vpop.eup %1010 }
 0x118   :  { %787 = vst [vmem:[#allocation17 + $0x18] sm:$0xff] %v1011_v59 }
 0x121   :  { %v1013_v60 = vpop.eup %1012 }
 0x122   :  { %790 = vst [vmem:[#allocation17 + $0x20] sm:$0xff] %v1013_v60 }
 0x123   :  { %1133 = shalt.err (!%p1130_p11)
}
 0x124   :  { %s1943_s22 = sld [smem:[#allocation29_spill]] }
 0x12a   :  { %802 = dma.vmem_to_hbm [thread:$0]  %s797_s4, 640, %s1943_s22, [#allocation3], %s1941_s21, %s1941_s21, %s1940_s19  }
 0x12b   :  { %1156 = dma.done.wait [#allocation3], 640  }
 0x12c   :  { %1157 = vsyncadd [#allocation3], 4294966656 }
 0x12d   :  { %1158 = dma.done.wait [#allocation19], 256  }
 0x12e   :  { %1159 = vsyncadd [#allocation19], 4294967040 }
 0x12f   :  { %821 = vsyncpa [#allocation3], 1 }
 0x130   :  { %822 = vsyncpa [#allocation19], 1 }
 0x131   :  { %823 = vsyncpa [#allocation4], 1 }
 0x132   :  { %824 = vsyncpa [#allocation10], 1 }
 0x133   :  { %825 = vsyncpa [#allocation5], 1 }
 0x134   :  { %826 = vsyncpa [#allocation7], 1 }
 0x135   :  { %827 = vsyncpa [#allocation13], 1 }
 0x136   :  { %828 = vsyncpa [#allocation16], 1 }

</bundles_post_ra>
